<compile_context>
chip_gen: v7x
topology: tpu7x:2x2x1
jax: 0.10.0
libtpu: 0.0.40
codegen_flags: <defaults>
</compile_context>

<pallas_src>
from functools import partial

import jax
import jax.numpy as jnp
from jax.experimental import pallas as pl
from jax.experimental.pallas import tpu as pltpu

BN_EPS = 1e-5
LANE = 128
SUBLANE = 8


def _round_up(x, m):
    return (x + m - 1) // m * m


def _pad2(x, rows, cols):
    r, c = x.shape
    return jnp.pad(x, ((0, rows - r), (0, cols - c)))


def _vmem_limit_bytes():
    """Pick a per-chip VMEM budget (v5e/v6e: 128 MiB parts, v7x: 64 MiB)."""
    try:
        cap = int(pltpu.get_tpu_info().vmem_capacity_bytes)
    except Exception:
        cap = 64 * 1024 * 1024
    return max(32 * 1024 * 1024, min(int(cap * 3 // 4), 100 * 1024 * 1024))


# --------------------------- fused forward kernel ---------------------------
def fused_gin_kernel(eps_ref, a_ref, x_ref, p_ref,
                     w1s_ref, b1s_ref, w2s_ref, b2s_ref, sc_ref, sh_ref,
                     hw1_ref, hb1_ref, hw2_ref, hb2_ref, hw3_ref, hb3_ref,
                     o_ref, *, nb_layers):
    a = a_ref[...]                      # bf16 [Np, Np] adjacency, A[dst, src] = #edges
    h = x_ref[...]                      # bf16 [Np, Dp] scaled + padded node features

    for l in range(nb_layers):          # static unroll: h stays in vregs/VMEM
        eps_l = eps_ref[l]              # SMEM scalar (learned eps, train_eps=True)
        # GINConv aggregation: (1 + eps)*x_i + sum_{j in N(i)} x_j == (1+eps)*h + A @ h
        agg = jnp.dot(a, h, preferred_element_type=jnp.float32)       # bf16 x bf16 -> f32
        z = (1.0 + eps_l) * h.astype(jnp.float32) + agg               # f32 epilogue
        # nn = Linear -> ReLU -> Linear -> ReLU -> BN (folded scale/shift), then outer ReLU
        z = jnp.maximum(
            jnp.dot(z.astype(jnp.bfloat16), w1s_ref[l],
                    preferred_element_type=jnp.float32) + b1s_ref[l], 0.0)
        z = jnp.maximum(
            jnp.dot(z.astype(jnp.bfloat16), w2s_ref[l],
                    preferred_element_type=jnp.float32) + b2s_ref[l], 0.0)
        h = jnp.maximum(z * sc_ref[l] + sh_ref[l], 0.0).astype(jnp.bfloat16)

    # global_add_pool: P[g, n] @ h sums node features per graph (padded cols are 0)
    g = jnp.dot(p_ref[...], h, preferred_element_type=jnp.float32)
    # fc head (dropout p=0.1 is identity in eval mode)
    g = jnp.maximum(
        jnp.dot(g.astype(jnp.bfloat16), hw1_ref[...],
                preferred_element_type=jnp.float32) + hb1_ref[...], 0.0)
    g = jnp.maximum(
        jnp.dot(g.astype(jnp.bfloat16), hw2_ref[...],
                preferred_element_type=jnp.float32) + hb2_ref[...], 0.0)
    o_ref[...] = jnp.dot(g.astype(jnp.bfloat16), hw3_ref[...],
                         preferred_element_type=jnp.float32) + hb3_ref[...]


def fused_gin_call(eps, a, x, p, conv_stack, head_p, nb_layers):
    np_, dp = x.shape
    gp = p.shape[0]
    cp = head_p["w3"].shape[1]
    args = (eps, a, x, p,
            conv_stack["w1"], conv_stack["b1"], conv_stack["w2"], conv_stack["b2"],
            conv_stack["scale"], conv_stack["shift"],
            head_p["w1"], head_p["b1"], head_p["w2"], head_p["b2"],
            head_p["w3"], head_p["b3"])

    flops = nb_layers * (2 * np_ * np_ * dp + 4 * np_ * dp * dp) \
        + 2 * gp * np_ * dp + 2 * gp * dp * dp + 2 * gp * dp * cp
    bytes_acc = sum(int(v.size) * v.dtype.itemsize for v in args) + gp * cp * 4

    in_specs = [pl.BlockSpec(memory_space=pltpu.MemorySpace.SMEM)]          # eps
    in_specs += [pl.BlockSpec(memory_space=pltpu.MemorySpace.VMEM)
                 for _ in range(len(args) - 1)]

    return pl.pallas_call(
        partial(fused_gin_kernel, nb_layers=nb_layers),
        out_shape=jax.ShapeDtypeStruct((gp, cp), jnp.float32),
        in_specs=in_specs,
        out_specs=pl.BlockSpec(memory_space=pltpu.MemorySpace.VMEM),
        compiler_params=pltpu.CompilerParams(vmem_limit_bytes=_vmem_limit_bytes()),
        cost_estimate=pl.CostEstimate(flops=flops, transcendentals=0,
                                      bytes_accessed=bytes_acc),
    )(*args)


# ----------------------------- parameter init -----------------------------
def _linear(key, d_in, d_out, scale=0.1):
    kw, kb = jax.random.split(key)
    # stored as [in, out] so the kernel computes x @ W + b (== PyTorch x @ W.T + b)
    w = scale * jax.random.normal(kw, (d_in, d_out), jnp.float32)
    b = scale * jax.random.normal(kb, (d_out,), jnp.float32)
    return w, b


def _gin_mlp(key, d_in, d_hidden):
    k1, k2 = jax.random.split(key)
    w1, b1 = _linear(k1, d_in, d_hidden)
    w2, b2 = _linear(k2, d_hidden, d_hidden)
    return {
        "w1": w1, "b1": b1, "w2": w2, "b2": b2,
        # BatchNorm1d default init / fresh running stats (eval mode)
        "gamma": jnp.ones((d_hidden,), jnp.float32),
        "beta": jnp.zeros((d_hidden,), jnp.float32),
        "rmean": jnp.zeros((d_hidden,), jnp.float32),
        "rvar": jnp.ones((d_hidden,), jnp.float32),
    }


def init_params(key, in_size, nb_class, d_model, nb_layers=4):
    keys = jax.random.split(key, nb_layers + 3)
    convs = [_gin_mlp(keys[0], in_size, d_model)]
    for i in range(nb_layers - 1):
        convs.append(_gin_mlp(keys[1 + i], d_model, d_model))
    w1, b1 = _linear(keys[nb_layers], d_model, d_model)
    w2, b2 = _linear(keys[nb_layers + 1], d_model, d_model // 2)
    w3, b3 = _linear(keys[nb_layers + 2], d_model // 2, nb_class)
    return {"convs": convs,
            "head": {"w1": w1, "b1": b1, "w2": w2, "b2": b2, "w3": w3, "b3": b3}}


def prepare_params(params):
    """Pad to 128 lanes, fold BN into scale/shift, stack per-layer weights.

    Weight matrices are stored in bf16 (MXU operands); biases and the folded
    BN scale/shift stay in f32 (elementwise epilogue stays f32).
    """
    in_size = params["convs"][0]["w1"].shape[0]
    d_model = params["convs"][0]["w1"].shape[1]
    d_half = params["head"]["w2"].shape[1]
    nb_class = params["head"]["w3"].shape[1]

    dp = _round_up(max(in_size, d_model), LANE)
    hp_ = _round_up(max(d_half, 1), LANE)
    cp = _round_up(nb_class, LANE)

    w1s, b1s, w2s, b2s, scs, shs = [], [], [], [], [], []
    for conv in params["convs"]:
        w1s.append(_pad2(conv["w1"], dp, dp))
        b1s.append(_pad2(conv["b1"][None, :], 1, dp))
        w2s.append(_pad2(conv["w2"], dp, dp))
        b2s.append(_pad2(conv["b2"][None, :], 1, dp))
        # fold BatchNorm1d (eval) into one scale/shift; padded channels get 0/0
        scale = conv["gamma"] * jax.lax.rsqrt(conv["rvar"] + BN_EPS)
        shift = conv["beta"] - conv["rmean"] * scale
        scs.append(_pad2(scale[None, :], 1, dp))
        shs.append(_pad2(shift[None, :], 1, dp))

    conv_stack = {"w1": jnp.stack(w1s).astype(jnp.bfloat16),
                  "b1": jnp.stack(b1s),
                  "w2": jnp.stack(w2s).astype(jnp.bfloat16),
                  "b2": jnp.stack(b2s),
                  "scale": jnp.stack(scs), "shift": jnp.stack(shs)}

    hd = params["head"]
    head_p = {"w1": _pad2(hd["w1"], dp, dp).astype(jnp.bfloat16),
              "b1": _pad2(hd["b1"][None, :], 1, dp),
              "w2": _pad2(hd["w2"], dp, hp_).astype(jnp.bfloat16),
              "b2": _pad2(hd["b2"][None, :], 1, hp_),
              "w3": _pad2(hd["w3"], hp_, cp).astype(jnp.bfloat16),
              "b3": _pad2(hd["b3"][None, :], 1, cp)}
    return conv_stack, head_p


# ------------------------------ full forward ------------------------------
@partial(jax.jit, static_argnames=("num_graphs", "nb_layers", "nb_class"))
def gin_forward(x, edge_index, batch, eps, conv_stack, head_p,
                num_graphs, nb_layers, nb_class):
    n, f = x.shape
    dp = conv_stack["w1"].shape[-1]
    np_ = _round_up(n, LANE)                      # pad nodes -> lane-dense A @ h
    gp = _round_up(max(num_graphs, 1), SUBLANE)   # pad graphs to full sublanes

    # StandardScaler.fit_transform: per-feature zero mean / unit std (ddof=0)
    mean = x.mean(axis=0, keepdims=True)
    std = jnp.sqrt(((x - mean) ** 2).mean(axis=0, keepdims=True))
    std = jnp.where(std == 0.0, 1.0, std)
    xs = ((x - mean) / std).astype(jnp.bfloat16)              # MXU operand dtype
    xs = jnp.pad(xs, ((0, np_ - n), (0, dp - f)))

    # dense adjacency: A[dst, src] += 1 (PyG 'add' aggregation). Scatter-add
    # directly into bf16 (counts are small integers -> exact in bf16, and no
    # f32 Np^2 intermediate is materialized).
    a = jnp.zeros((np_, np_), jnp.bfloat16).at[edge_index[1], edge_index[0]].add(
        jnp.ones((edge_index.shape[1],), jnp.bfloat16))

    # pooling matrix for global_add_pool (0/1, exact in bf16; padded rows/cols are 0)
    p = (batch[None, :] == jnp.arange(num_graphs)[:, None]).astype(jnp.bfloat16)
    p = jnp.pad(p, ((0, gp - num_graphs), (0, np_ - n)))

    eps = eps.astype(jnp.float32).reshape((nb_layers,))

    out = fused_gin_call(eps, a, xs, p, conv_stack, head_p, nb_layers)
    return out[:num_graphs, :nb_class]


if __name__ == "__main__":
    # small, module-consistent sizes
    N = 32          # nodes
    IN_SIZE = 16    # input node feature dim
    D_MODEL = 32    # hidden dim
    NB_CLASS = 8
    NB_LAYERS = 4
    NUM_GRAPHS = 2
    E = 64          # edges

    key = jax.random.PRNGKey(0)
    kx, ke, kp = jax.random.split(key, 3)

    x = jax.random.normal(kx, (N, IN_SIZE), jnp.float32)
    edge_index = jax.random.randint(ke, (2, E), 0, N, dtype=jnp.int32)
    batch = jnp.concatenate([
        jnp.zeros((N // 2,), jnp.int32),
        jnp.ones((N - N // 2,), jnp.int32),
    ])

    params = init_params(kp, IN_SIZE, NB_CLASS, D_MODEL, NB_LAYERS)
    conv_stack, head_p = prepare_params(params)

    # train_eps=True with eps initialized to 0 (runtime array -> no recompile if learned)
    eps = jnp.zeros((NB_LAYERS,), jnp.float32)

    out = gin_forward(x, edge_index, batch, eps, conv_stack, head_p,
                      num_graphs=NUM_GRAPHS, nb_layers=NB_LAYERS,
                      nb_class=NB_CLASS)
    out = jax.block_until_ready(out)
    assert out.shape == (NUM_GRAPHS, NB_CLASS)
    assert jnp.all(jnp.isfinite(out))
    print("KERNEL_OK")
</pallas_src>

<mosaic_0001>
module attributes {stable_mosaic.version = 11 : i64} {
  func.func @fused_gin_kernel(%arg0: memref<4xf32, #tpu.memory_space<smem>>, %arg1: memref<128x128xbf16, #tpu.memory_space<vmem>>, %arg2: memref<128x128xbf16, #tpu.memory_space<vmem>>, %arg3: memref<8x128xbf16, #tpu.memory_space<vmem>>, %arg4: memref<4x128x128xbf16, #tpu.memory_space<vmem>>, %arg5: memref<4x1x128xf32, #tpu.memory_space<vmem>>, %arg6: memref<4x128x128xbf16, #tpu.memory_space<vmem>>, %arg7: memref<4x1x128xf32, #tpu.memory_space<vmem>>, %arg8: memref<4x1x128xf32, #tpu.memory_space<vmem>>, %arg9: memref<4x1x128xf32, #tpu.memory_space<vmem>>, %arg10: memref<128x128xbf16, #tpu.memory_space<vmem>>, %arg11: memref<1x128xf32, #tpu.memory_space<vmem>>, %arg12: memref<128x128xbf16, #tpu.memory_space<vmem>>, %arg13: memref<1x128xf32, #tpu.memory_space<vmem>>, %arg14: memref<128x128xbf16, #tpu.memory_space<vmem>>, %arg15: memref<1x128xf32, #tpu.memory_space<vmem>>, %arg16: memref<8x128xf32, #tpu.memory_space<vmem>>) attributes {dimension_semantics = [], scalar_prefetch = 0 : i64, scratch_operands = 0 : i64, tpu.core_type = #tpu.core_type<tc>} {
    %c0 = arith.constant 0 : index
    %c0_0 = arith.constant 0 : index
    %0 = vector.load %arg1[%c0, %c0_0] : memref<128x128xbf16, #tpu.memory_space<vmem>>, vector<128x128xbf16>
    %c0_1 = arith.constant 0 : index
    %c0_2 = arith.constant 0 : index
    %1 = vector.load %arg2[%c0_1, %c0_2] : memref<128x128xbf16, #tpu.memory_space<vmem>>, vector<128x128xbf16>
    %c0_3 = arith.constant 0 : index
    %2 = memref.load %arg0[%c0_3] : memref<4xf32, #tpu.memory_space<smem>>
    %cst = arith.constant dense<0.000000e+00> : vector<128x128xf32>
    %3 = tpu.matmul %0, %1, %cst {dimension_numbers = #tpu.dot_dimension_numbers<[1], [0], [0], [1], [0, 0, 1, 1], [], []>} : vector<128x128xbf16>, vector<128x128xbf16>, vector<128x128xf32> -> vector<128x128xf32>
    %cst_4 = arith.constant 1.000000e+00 : f32
    %4 = arith.addf %cst_4, %2 : f32
    %5 = arith.extf %1 : vector<128x128xbf16> to vector<128x128xf32>
    %6 = vector.broadcast %4 : f32 to vector<128x128xf32>
    %7 = arith.mulf %6, %5 : vector<128x128xf32>
    %8 = arith.addf %7, %3 : vector<128x128xf32>
    %9 = arith.truncf %8 : vector<128x128xf32> to vector<128x128xbf16>
    %c0_5 = arith.constant 0 : index
    %c0_6 = arith.constant 0 : index
    %c0_7 = arith.constant 0 : index
    %10 = vector.load %arg4[%c0_5, %c0_6, %c0_7] : memref<4x128x128xbf16, #tpu.memory_space<vmem>>, vector<1x128x128xbf16>
    %11 = vector.shape_cast %10 : vector<1x128x128xbf16> to vector<128x128xbf16>
    %cst_8 = arith.constant dense<0.000000e+00> : vector<128x128xf32>
    %12 = tpu.matmul %9, %11, %cst_8 {dimension_numbers = #tpu.dot_dimension_numbers<[1], [0], [0], [1], [0, 0, 1, 1], [], []>} : vector<128x128xbf16>, vector<128x128xbf16>, vector<128x128xf32> -> vector<128x128xf32>
    %c0_9 = arith.constant 0 : index
    %c0_10 = arith.constant 0 : index
    %c0_11 = arith.constant 0 : index
    %13 = vector.load %arg5[%c0_9, %c0_10, %c0_11] : memref<4x1x128xf32, #tpu.memory_space<vmem>>, vector<1x1x128xf32>
    %14 = vector.shape_cast %13 : vector<1x1x128xf32> to vector<1x128xf32>
    %15 = vector.broadcast %14 : vector<1x128xf32> to vector<128x128xf32>
    %16 = arith.addf %12, %15 : vector<128x128xf32>
    %cst_12 = arith.constant 0.000000e+00 : f32
    %17 = vector.broadcast %cst_12 : f32 to vector<128x128xf32>
    %18 = arith.maximumf %16, %17 : vector<128x128xf32>
    %19 = arith.truncf %18 : vector<128x128xf32> to vector<128x128xbf16>
    %c0_13 = arith.constant 0 : index
    %c0_14 = arith.constant 0 : index
    %c0_15 = arith.constant 0 : index
    %20 = vector.load %arg6[%c0_13, %c0_14, %c0_15] : memref<4x128x128xbf16, #tpu.memory_space<vmem>>, vector<1x128x128xbf16>
    %21 = vector.shape_cast %20 : vector<1x128x128xbf16> to vector<128x128xbf16>
    %cst_16 = arith.constant dense<0.000000e+00> : vector<128x128xf32>
    %22 = tpu.matmul %19, %21, %cst_16 {dimension_numbers = #tpu.dot_dimension_numbers<[1], [0], [0], [1], [0, 0, 1, 1], [], []>} : vector<128x128xbf16>, vector<128x128xbf16>, vector<128x128xf32> -> vector<128x128xf32>
    %c0_17 = arith.constant 0 : index
    %c0_18 = arith.constant 0 : index
    %c0_19 = arith.constant 0 : index
    %23 = vector.load %arg7[%c0_17, %c0_18, %c0_19] : memref<4x1x128xf32, #tpu.memory_space<vmem>>, vector<1x1x128xf32>
    %24 = vector.shape_cast %23 : vector<1x1x128xf32> to vector<1x128xf32>
    %25 = vector.broadcast %24 : vector<1x128xf32> to vector<128x128xf32>
    %26 = arith.addf %22, %25 : vector<128x128xf32>
    %cst_20 = arith.constant 0.000000e+00 : f32
    %27 = vector.broadcast %cst_20 : f32 to vector<128x128xf32>
    %28 = arith.maximumf %26, %27 : vector<128x128xf32>
    %c0_21 = arith.constant 0 : index
    %c0_22 = arith.constant 0 : index
    %c0_23 = arith.constant 0 : index
    %29 = vector.load %arg8[%c0_21, %c0_22, %c0_23] : memref<4x1x128xf32, #tpu.memory_space<vmem>>, vector<1x1x128xf32>
    %30 = vector.shape_cast %29 : vector<1x1x128xf32> to vector<1x128xf32>
    %31 = vector.broadcast %30 : vector<1x128xf32> to vector<128x128xf32>
    %32 = arith.mulf %28, %31 : vector<128x128xf32>
    %c0_24 = arith.constant 0 : index
    %c0_25 = arith.constant 0 : index
    %c0_26 = arith.constant 0 : index
    %33 = vector.load %arg9[%c0_24, %c0_25, %c0_26] : memref<4x1x128xf32, #tpu.memory_space<vmem>>, vector<1x1x128xf32>
    %34 = vector.shape_cast %33 : vector<1x1x128xf32> to vector<1x128xf32>
    %35 = vector.broadcast %34 : vector<1x128xf32> to vector<128x128xf32>
    %36 = arith.addf %32, %35 : vector<128x128xf32>
    %cst_27 = arith.constant 0.000000e+00 : f32
    %37 = vector.broadcast %cst_27 : f32 to vector<128x128xf32>
    %38 = arith.maximumf %36, %37 : vector<128x128xf32>
    %39 = arith.truncf %38 : vector<128x128xf32> to vector<128x128xbf16>
    %c1 = arith.constant 1 : index
    %40 = memref.load %arg0[%c1] : memref<4xf32, #tpu.memory_space<smem>>
    %cst_28 = arith.constant dense<0.000000e+00> : vector<128x128xf32>
    %41 = tpu.matmul %0, %39, %cst_28 {dimension_numbers = #tpu.dot_dimension_numbers<[1], [0], [0], [1], [0, 0, 1, 1], [], []>} : vector<128x128xbf16>, vector<128x128xbf16>, vector<128x128xf32> -> vector<128x128xf32>
    %cst_29 = arith.constant 1.000000e+00 : f32
    %42 = arith.addf %cst_29, %40 : f32
    %43 = arith.extf %39 : vector<128x128xbf16> to vector<128x128xf32>
    %44 = vector.broadcast %42 : f32 to vector<128x128xf32>
    %45 = arith.mulf %44, %43 : vector<128x128xf32>
    %46 = arith.addf %45, %41 : vector<128x128xf32>
    %47 = arith.truncf %46 : vector<128x128xf32> to vector<128x128xbf16>
    %c1_30 = arith.constant 1 : index
    %c0_31 = arith.constant 0 : index
    %c0_32 = arith.constant 0 : index
    %48 = vector.load %arg4[%c1_30, %c0_31, %c0_32] : memref<4x128x128xbf16, #tpu.memory_space<vmem>>, vector<1x128x128xbf16>
    %49 = vector.shape_cast %48 : vector<1x128x128xbf16> to vector<128x128xbf16>
    %cst_33 = arith.constant dense<0.000000e+00> : vector<128x128xf32>
    %50 = tpu.matmul %47, %49, %cst_33 {dimension_numbers = #tpu.dot_dimension_numbers<[1], [0], [0], [1], [0, 0, 1, 1], [], []>} : vector<128x128xbf16>, vector<128x128xbf16>, vector<128x128xf32> -> vector<128x128xf32>
    %c1_34 = arith.constant 1 : index
    %c0_35 = arith.constant 0 : index
    %c0_36 = arith.constant 0 : index
    %51 = vector.load %arg5[%c1_34, %c0_35, %c0_36] : memref<4x1x128xf32, #tpu.memory_space<vmem>>, vector<1x1x128xf32>
    %52 = vector.shape_cast %51 : vector<1x1x128xf32> to vector<1x128xf32>
    %53 = vector.broadcast %52 : vector<1x128xf32> to vector<128x128xf32>
    %54 = arith.addf %50, %53 : vector<128x128xf32>
    %cst_37 = arith.constant 0.000000e+00 : f32
    %55 = vector.broadcast %cst_37 : f32 to vector<128x128xf32>
    %56 = arith.maximumf %54, %55 : vector<128x128xf32>
    %57 = arith.truncf %56 : vector<128x128xf32> to vector<128x128xbf16>
    %c1_38 = arith.constant 1 : index
    %c0_39 = arith.constant 0 : index
    %c0_40 = arith.constant 0 : index
    %58 = vector.load %arg6[%c1_38, %c0_39, %c0_40] : memref<4x128x128xbf16, #tpu.memory_space<vmem>>, vector<1x128x128xbf16>
    %59 = vector.shape_cast %58 : vector<1x128x128xbf16> to vector<128x128xbf16>
    %cst_41 = arith.constant dense<0.000000e+00> : vector<128x128xf32>
    %60 = tpu.matmul %57, %59, %cst_41 {dimension_numbers = #tpu.dot_dimension_numbers<[1], [0], [0], [1], [0, 0, 1, 1], [], []>} : vector<128x128xbf16>, vector<128x128xbf16>, vector<128x128xf32> -> vector<128x128xf32>
    %c1_42 = arith.constant 1 : index
    %c0_43 = arith.constant 0 : index
    %c0_44 = arith.constant 0 : index
    %61 = vector.load %arg7[%c1_42, %c0_43, %c0_44] : memref<4x1x128xf32, #tpu.memory_space<vmem>>, vector<1x1x128xf32>
    %62 = vector.shape_cast %61 : vector<1x1x128xf32> to vector<1x128xf32>
    %63 = vector.broadcast %62 : vector<1x128xf32> to vector<128x128xf32>
    %64 = arith.addf %60, %63 : vector<128x128xf32>
    %cst_45 = arith.constant 0.000000e+00 : f32
    %65 = vector.broadcast %cst_45 : f32 to vector<128x128xf32>
    %66 = arith.maximumf %64, %65 : vector<128x128xf32>
    %c1_46 = arith.constant 1 : index
    %c0_47 = arith.constant 0 : index
    %c0_48 = arith.constant 0 : index
    %67 = vector.load %arg8[%c1_46, %c0_47, %c0_48] : memref<4x1x128xf32, #tpu.memory_space<vmem>>, vector<1x1x128xf32>
    %68 = vector.shape_cast %67 : vector<1x1x128xf32> to vector<1x128xf32>
    %69 = vector.broadcast %68 : vector<1x128xf32> to vector<128x128xf32>
    %70 = arith.mulf %66, %69 : vector<128x128xf32>
    %c1_49 = arith.constant 1 : index
    %c0_50 = arith.constant 0 : index
    %c0_51 = arith.constant 0 : index
    %71 = vector.load %arg9[%c1_49, %c0_50, %c0_51] : memref<4x1x128xf32, #tpu.memory_space<vmem>>, vector<1x1x128xf32>
    %72 = vector.shape_cast %71 : vector<1x1x128xf32> to vector<1x128xf32>
    %73 = vector.broadcast %72 : vector<1x128xf32> to vector<128x128xf32>
    %74 = arith.addf %70, %73 : vector<128x128xf32>
    %cst_52 = arith.constant 0.000000e+00 : f32
    %75 = vector.broadcast %cst_52 : f32 to vector<128x128xf32>
    %76 = arith.maximumf %74, %75 : vector<128x128xf32>
    %77 = arith.truncf %76 : vector<128x128xf32> to vector<128x128xbf16>
    %c2 = arith.constant 2 : index
    %78 = memref.load %arg0[%c2] : memref<4xf32, #tpu.memory_space<smem>>
    %cst_53 = arith.constant dense<0.000000e+00> : vector<128x128xf32>
    %79 = tpu.matmul %0, %77, %cst_53 {dimension_numbers = #tpu.dot_dimension_numbers<[1], [0], [0], [1], [0, 0, 1, 1], [], []>} : vector<128x128xbf16>, vector<128x128xbf16>, vector<128x128xf32> -> vector<128x128xf32>
    %cst_54 = arith.constant 1.000000e+00 : f32
    %80 = arith.addf %cst_54, %78 : f32
    %81 = arith.extf %77 : vector<128x128xbf16> to vector<128x128xf32>
    %82 = vector.broadcast %80 : f32 to vector<128x128xf32>
    %83 = arith.mulf %82, %81 : vector<128x128xf32>
    %84 = arith.addf %83, %79 : vector<128x128xf32>
    %85 = arith.truncf %84 : vector<128x128xf32> to vector<128x128xbf16>
    %c2_55 = arith.constant 2 : index
    %c0_56 = arith.constant 0 : index
    %c0_57 = arith.constant 0 : index
    %86 = vector.load %arg4[%c2_55, %c0_56, %c0_57] : memref<4x128x128xbf16, #tpu.memory_space<vmem>>, vector<1x128x128xbf16>
    %87 = vector.shape_cast %86 : vector<1x128x128xbf16> to vector<128x128xbf16>
    %cst_58 = arith.constant dense<0.000000e+00> : vector<128x128xf32>
    %88 = tpu.matmul %85, %87, %cst_58 {dimension_numbers = #tpu.dot_dimension_numbers<[1], [0], [0], [1], [0, 0, 1, 1], [], []>} : vector<128x128xbf16>, vector<128x128xbf16>, vector<128x128xf32> -> vector<128x128xf32>
    %c2_59 = arith.constant 2 : index
    %c0_60 = arith.constant 0 : index
    %c0_61 = arith.constant 0 : index
    %89 = vector.load %arg5[%c2_59, %c0_60, %c0_61] : memref<4x1x128xf32, #tpu.memory_space<vmem>>, vector<1x1x128xf32>
    %90 = vector.shape_cast %89 : vector<1x1x128xf32> to vector<1x128xf32>
    %91 = vector.broadcast %90 : vector<1x128xf32> to vector<128x128xf32>
    %92 = arith.addf %88, %91 : vector<128x128xf32>
    %cst_62 = arith.constant 0.000000e+00 : f32
    %93 = vector.broadcast %cst_62 : f32 to vector<128x128xf32>
    %94 = arith.maximumf %92, %93 : vector<128x128xf32>
    %95 = arith.truncf %94 : vector<128x128xf32> to vector<128x128xbf16>
    %c2_63 = arith.constant 2 : index
    %c0_64 = arith.constant 0 : index
    %c0_65 = arith.constant 0 : index
    %96 = vector.load %arg6[%c2_63, %c0_64, %c0_65] : memref<4x128x128xbf16, #tpu.memory_space<vmem>>, vector<1x128x128xbf16>
    %97 = vector.shape_cast %96 : vector<1x128x128xbf16> to vector<128x128xbf16>
    %cst_66 = arith.constant dense<0.000000e+00> : vector<128x128xf32>
    %98 = tpu.matmul %95, %97, %cst_66 {dimension_numbers = #tpu.dot_dimension_numbers<[1], [0], [0], [1], [0, 0, 1, 1], [], []>} : vector<128x128xbf16>, vector<128x128xbf16>, vector<128x128xf32> -> vector<128x128xf32>
    %c2_67 = arith.constant 2 : index
    %c0_68 = arith.constant 0 : index
    %c0_69 = arith.constant 0 : index
    %99 = vector.load %arg7[%c2_67, %c0_68, %c0_69] : memref<4x1x128xf32, #tpu.memory_space<vmem>>, vector<1x1x128xf32>
    %100 = vector.shape_cast %99 : vector<1x1x128xf32> to vector<1x128xf32>
    %101 = vector.broadcast %100 : vector<1x128xf32> to vector<128x128xf32>
    %102 = arith.addf %98, %101 : vector<128x128xf32>
    %cst_70 = arith.constant 0.000000e+00 : f32
    %103 = vector.broadcast %cst_70 : f32 to vector<128x128xf32>
    %104 = arith.maximumf %102, %103 : vector<128x128xf32>
    %c2_71 = arith.constant 2 : index
    %c0_72 = arith.constant 0 : index
    %c0_73 = arith.constant 0 : index
    %105 = vector.load %arg8[%c2_71, %c0_72, %c0_73] : memref<4x1x128xf32, #tpu.memory_space<vmem>>, vector<1x1x128xf32>
    %106 = vector.shape_cast %105 : vector<1x1x128xf32> to vector<1x128xf32>
    %107 = vector.broadcast %106 : vector<1x128xf32> to vector<128x128xf32>
    %108 = arith.mulf %104, %107 : vector<128x128xf32>
    %c2_74 = arith.constant 2 : index
    %c0_75 = arith.constant 0 : index
    %c0_76 = arith.constant 0 : index
    %109 = vector.load %arg9[%c2_74, %c0_75, %c0_76] : memref<4x1x128xf32, #tpu.memory_space<vmem>>, vector<1x1x128xf32>
    %110 = vector.shape_cast %109 : vector<1x1x128xf32> to vector<1x128xf32>
    %111 = vector.broadcast %110 : vector<1x128xf32> to vector<128x128xf32>
    %112 = arith.addf %108, %111 : vector<128x128xf32>
    %cst_77 = arith.constant 0.000000e+00 : f32
    %113 = vector.broadcast %cst_77 : f32 to vector<128x128xf32>
    %114 = arith.maximumf %112, %113 : vector<128x128xf32>
    %115 = arith.truncf %114 : vector<128x128xf32> to vector<128x128xbf16>
    %c3 = arith.constant 3 : index
    %116 = memref.load %arg0[%c3] : memref<4xf32, #tpu.memory_space<smem>>
    %cst_78 = arith.constant dense<0.000000e+00> : vector<128x128xf32>
    %117 = tpu.matmul %0, %115, %cst_78 {dimension_numbers = #tpu.dot_dimension_numbers<[1], [0], [0], [1], [0, 0, 1, 1], [], []>} : vector<128x128xbf16>, vector<128x128xbf16>, vector<128x128xf32> -> vector<128x128xf32>
    %cst_79 = arith.constant 1.000000e+00 : f32
    %118 = arith.addf %cst_79, %116 : f32
    %119 = arith.extf %115 : vector<128x128xbf16> to vector<128x128xf32>
    %120 = vector.broadcast %118 : f32 to vector<128x128xf32>
    %121 = arith.mulf %120, %119 : vector<128x128xf32>
    %122 = arith.addf %121, %117 : vector<128x128xf32>
    %123 = arith.truncf %122 : vector<128x128xf32> to vector<128x128xbf16>
    %c3_80 = arith.constant 3 : index
    %c0_81 = arith.constant 0 : index
    %c0_82 = arith.constant 0 : index
    %124 = vector.load %arg4[%c3_80, %c0_81, %c0_82] : memref<4x128x128xbf16, #tpu.memory_space<vmem>>, vector<1x128x128xbf16>
    %125 = vector.shape_cast %124 : vector<1x128x128xbf16> to vector<128x128xbf16>
    %cst_83 = arith.constant dense<0.000000e+00> : vector<128x128xf32>
    %126 = tpu.matmul %123, %125, %cst_83 {dimension_numbers = #tpu.dot_dimension_numbers<[1], [0], [0], [1], [0, 0, 1, 1], [], []>} : vector<128x128xbf16>, vector<128x128xbf16>, vector<128x128xf32> -> vector<128x128xf32>
    %c3_84 = arith.constant 3 : index
    %c0_85 = arith.constant 0 : index
    %c0_86 = arith.constant 0 : index
    %127 = vector.load %arg5[%c3_84, %c0_85, %c0_86] : memref<4x1x128xf32, #tpu.memory_space<vmem>>, vector<1x1x128xf32>
    %128 = vector.shape_cast %127 : vector<1x1x128xf32> to vector<1x128xf32>
    %129 = vector.broadcast %128 : vector<1x128xf32> to vector<128x128xf32>
    %130 = arith.addf %126, %129 : vector<128x128xf32>
    %cst_87 = arith.constant 0.000000e+00 : f32
    %131 = vector.broadcast %cst_87 : f32 to vector<128x128xf32>
    %132 = arith.maximumf %130, %131 : vector<128x128xf32>
    %133 = arith.truncf %132 : vector<128x128xf32> to vector<128x128xbf16>
    %c3_88 = arith.constant 3 : index
    %c0_89 = arith.constant 0 : index
    %c0_90 = arith.constant 0 : index
    %134 = vector.load %arg6[%c3_88, %c0_89, %c0_90] : memref<4x128x128xbf16, #tpu.memory_space<vmem>>, vector<1x128x128xbf16>
    %135 = vector.shape_cast %134 : vector<1x128x128xbf16> to vector<128x128xbf16>
    %cst_91 = arith.constant dense<0.000000e+00> : vector<128x128xf32>
    %136 = tpu.matmul %133, %135, %cst_91 {dimension_numbers = #tpu.dot_dimension_numbers<[1], [0], [0], [1], [0, 0, 1, 1], [], []>} : vector<128x128xbf16>, vector<128x128xbf16>, vector<128x128xf32> -> vector<128x128xf32>
    %c3_92 = arith.constant 3 : index
    %c0_93 = arith.constant 0 : index
    %c0_94 = arith.constant 0 : index
    %137 = vector.load %arg7[%c3_92, %c0_93, %c0_94] : memref<4x1x128xf32, #tpu.memory_space<vmem>>, vector<1x1x128xf32>
    %138 = vector.shape_cast %137 : vector<1x1x128xf32> to vector<1x128xf32>
    %139 = vector.broadcast %138 : vector<1x128xf32> to vector<128x128xf32>
    %140 = arith.addf %136, %139 : vector<128x128xf32>
    %cst_95 = arith.constant 0.000000e+00 : f32
    %141 = vector.broadcast %cst_95 : f32 to vector<128x128xf32>
    %142 = arith.maximumf %140, %141 : vector<128x128xf32>
    %c3_96 = arith.constant 3 : index
    %c0_97 = arith.constant 0 : index
    %c0_98 = arith.constant 0 : index
    %143 = vector.load %arg8[%c3_96, %c0_97, %c0_98] : memref<4x1x128xf32, #tpu.memory_space<vmem>>, vector<1x1x128xf32>
    %144 = vector.shape_cast %143 : vector<1x1x128xf32> to vector<1x128xf32>
    %145 = vector.broadcast %144 : vector<1x128xf32> to vector<128x128xf32>
    %146 = arith.mulf %142, %145 : vector<128x128xf32>
    %c3_99 = arith.constant 3 : index
    %c0_100 = arith.constant 0 : index
    %c0_101 = arith.constant 0 : index
    %147 = vector.load %arg9[%c3_99, %c0_100, %c0_101] : memref<4x1x128xf32, #tpu.memory_space<vmem>>, vector<1x1x128xf32>
    %148 = vector.shape_cast %147 : vector<1x1x128xf32> to vector<1x128xf32>
    %149 = vector.broadcast %148 : vector<1x128xf32> to vector<128x128xf32>
    %150 = arith.addf %146, %149 : vector<128x128xf32>
    %cst_102 = arith.constant 0.000000e+00 : f32
    %151 = vector.broadcast %cst_102 : f32 to vector<128x128xf32>
    %152 = arith.maximumf %150, %151 : vector<128x128xf32>
    %153 = arith.truncf %152 : vector<128x128xf32> to vector<128x128xbf16>
    %c0_103 = arith.constant 0 : index
    %c0_104 = arith.constant 0 : index
    %154 = vector.load %arg3[%c0_103, %c0_104] : memref<8x128xbf16, #tpu.memory_space<vmem>>, vector<8x128xbf16>
    %cst_105 = arith.constant dense<0.000000e+00> : vector<8x128xf32>
    %155 = tpu.matmul %154, %153, %cst_105 {dimension_numbers = #tpu.dot_dimension_numbers<[1], [0], [0], [1], [0, 0, 1, 1], [], []>} : vector<8x128xbf16>, vector<128x128xbf16>, vector<8x128xf32> -> vector<8x128xf32>
    %156 = arith.truncf %155 : vector<8x128xf32> to vector<8x128xbf16>
    %c0_106 = arith.constant 0 : index
    %c0_107 = arith.constant 0 : index
    %157 = vector.load %arg10[%c0_106, %c0_107] : memref<128x128xbf16, #tpu.memory_space<vmem>>, vector<128x128xbf16>
    %cst_108 = arith.constant dense<0.000000e+00> : vector<8x128xf32>
    %158 = tpu.matmul %156, %157, %cst_108 {dimension_numbers = #tpu.dot_dimension_numbers<[1], [0], [0], [1], [0, 0, 1, 1], [], []>} : vector<8x128xbf16>, vector<128x128xbf16>, vector<8x128xf32> -> vector<8x128xf32>
    %c0_109 = arith.constant 0 : index
    %c0_110 = arith.constant 0 : index
    %159 = vector.load %arg11[%c0_109, %c0_110] : memref<1x128xf32, #tpu.memory_space<vmem>>, vector<1x128xf32>
    %160 = vector.broadcast %159 : vector<1x128xf32> to vector<8x128xf32>
    %161 = arith.addf %158, %160 : vector<8x128xf32>
    %cst_111 = arith.constant 0.000000e+00 : f32
    %162 = vector.broadcast %cst_111 : f32 to vector<8x128xf32>
    %163 = arith.maximumf %161, %162 : vector<8x128xf32>
    %164 = arith.truncf %163 : vector<8x128xf32> to vector<8x128xbf16>
    %c0_112 = arith.constant 0 : index
    %c0_113 = arith.constant 0 : index
    %165 = vector.load %arg12[%c0_112, %c0_113] : memref<128x128xbf16, #tpu.memory_space<vmem>>, vector<128x128xbf16>
    %cst_114 = arith.constant dense<0.000000e+00> : vector<8x128xf32>
    %166 = tpu.matmul %164, %165, %cst_114 {dimension_numbers = #tpu.dot_dimension_numbers<[1], [0], [0], [1], [0, 0, 1, 1], [], []>} : vector<8x128xbf16>, vector<128x128xbf16>, vector<8x128xf32> -> vector<8x128xf32>
    %c0_115 = arith.constant 0 : index
    %c0_116 = arith.constant 0 : index
    %167 = vector.load %arg13[%c0_115, %c0_116] : memref<1x128xf32, #tpu.memory_space<vmem>>, vector<1x128xf32>
    %168 = vector.broadcast %167 : vector<1x128xf32> to vector<8x128xf32>
    %169 = arith.addf %166, %168 : vector<8x128xf32>
    %cst_117 = arith.constant 0.000000e+00 : f32
    %170 = vector.broadcast %cst_117 : f32 to vector<8x128xf32>
    %171 = arith.maximumf %169, %170 : vector<8x128xf32>
    %172 = arith.truncf %171 : vector<8x128xf32> to vector<8x128xbf16>
    %c0_118 = arith.constant 0 : index
    %c0_119 = arith.constant 0 : index
    %173 = vector.load %arg14[%c0_118, %c0_119] : memref<128x128xbf16, #tpu.memory_space<vmem>>, vector<128x128xbf16>
    %cst_120 = arith.constant dense<0.000000e+00> : vector<8x128xf32>
    %174 = tpu.matmul %172, %173, %cst_120 {dimension_numbers = #tpu.dot_dimension_numbers<[1], [0], [0], [1], [0, 0, 1, 1], [], []>} : vector<8x128xbf16>, vector<128x128xbf16>, vector<8x128xf32> -> vector<8x128xf32>
    %c0_121 = arith.constant 0 : index
    %c0_122 = arith.constant 0 : index
    %175 = vector.load %arg15[%c0_121, %c0_122] : memref<1x128xf32, #tpu.memory_space<vmem>>, vector<1x128xf32>
    %176 = vector.broadcast %175 : vector<1x128xf32> to vector<8x128xf32>
    %177 = arith.addf %174, %176 : vector<8x128xf32>
    %c0_123 = arith.constant 0 : index
    %c0_124 = arith.constant 0 : index
    %178 = vector.load %arg16[%c0_123, %c0_124] : memref<8x128xf32, #tpu.memory_space<vmem>>, vector<8x128xf32>
    tpu.vector_store %arg16[%c0_123, %c0_124], %177 {strides = array<i32>} : memref<8x128xf32, #tpu.memory_space<vmem>>, vector<8x128xf32>,
    return
  }
}

</mosaic_0001>

<bundles_post_ra>
// kernel: gin_forward.1
= control target key start
LH: loop header
LB: loop body
LE: loop exit
PB: predicated region body
PF: predicated region fallthrough
CT: control target
= control target key end

     0   :  { %s5143_s0 = inlined_call_operand.vmem [shape: f32[4], index: 0, kind: input, shape index: {}]   ;;  %s5144_s1 = inlined_call_operand.vmem [shape: bf16[128,128], index: 1, kind: input, shape index: {}]   ;;  %s5145_s2 = inlined_call_operand.vmem [shape: bf16[128,128], index: 2, kind: input, shape index: {}]   ;;  %s5146_s3 = inlined_call_operand.vmem [shape: bf16[8,128], index: 3, kind: input, shape index: {}]   ;;  %s5147_s4 = inlined_call_operand.vmem [shape: bf16[4,128,128], index: 4, kind: input, shape index: {}]   ;;  %s5148_s5 = inlined_call_operand.vmem [shape: f32[4,1,128], index: 5, kind: input, shape index: {}]   ;;  %s5149_s6 = inlined_call_operand.vmem [shape: bf16[4,128,128], index: 6, kind: input, shape index: {}]   ;;  %s5150_s7 = inlined_call_operand.vmem [shape: f32[4,1,128], index: 7, kind: input, shape index: {}]   ;;  %s5151_s8 = inlined_call_operand.vmem [shape: f32[4,1,128], index: 8, kind: input, shape index: {}]   ;;  %s5152_s9 = inlined_call_operand.vmem [shape: f32[4,1,128], index: 9, kind: input, shape index: {}]   ;;  %s5153_s10 = inlined_call_operand.vmem [shape: bf16[128,128], index: 10, kind: input, shape index: {}]   ;;  %s5154_s11 = inlined_call_operand.vmem [shape: f32[1,128], index: 11, kind: input, shape index: {}]   ;;  %s5155_s12 = inlined_call_operand.vmem [shape: bf16[128,128], index: 12, kind: input, shape index: {}]   ;;  %s5156_s13 = inlined_call_operand.vmem [shape: f32[1,128], index: 13, kind: input, shape index: {}]   ;;  %s5157_s14 = inlined_call_operand.vmem [shape: bf16[128,128], index: 14, kind: input, shape index: {}]   ;;  %s5158_s15 = inlined_call_operand.vmem [shape: f32[1,128], index: 15, kind: input, shape index: {}]   ;;  %s5159_s16 = inlined_call_operand.vmem [shape: f32[8,128], index: 16, kind: output, shape index: {}]  }
   0x1   :  { %5160 = sst [smem:[#allocation5_spill]] %s5143_s0 }
   0x2   :  { %21 = vsyncpa [#allocation3], 0  ;;  %s5161_s23 = sld [smem:[#allocation5_spill]] }
   0x8   :  { %s28_s24 = sshll.u32 %s5161_s23, 4  ;;  %s29_s24 = int_to_ptr.vmem [resolvable:$true] %s28_s24 }
   0x9   :  { %s4055_s25 = scalar_lea.vmem %s29_s24, 16  ;;  %p4060_p1 = scmp.lt.s32.totalorder %s29_s24, %s29_s24 }
   0xa   :  { %p4056_p0 = scmp.ne.s32.totalorder %s29_s24, %s4055_s25  ;;  %p4061_p2 = scmp.lt.s32.totalorder %s4055_s25, %s4055_s25 }
   0xc   :  { %p4062_p3 = por %p4061_p2, %p4060_p1 }
   0xe   :  { %p4063_p4 = pnand %p4062_p3, %p4056_p0 }
  0x10   :  { %4066 = shalt.err (!%p4063_p4)
}
  0x11   :  { %s4069_s26 = smov [#allocation2]  }
  0x12   :  { %31 = dma.vmem_to_smem %s29_s24, 16, %s4069_s26, [#allocation3]  }
  0x13   :  { %4067 = dma.done.wait [#allocation3], 16  }
  0x14   :  { %4068 = vsyncadd [#allocation3], 4294967280 }
  0x15   :  { %65 = sfence }
  0x16   :  { %v4163_v0 = vld [vmem:[%s5145_s2] sm:$0xff]   ;;  %v4168_v1 = vld [vmem:[%s5145_s2 + $0x8] sm:$0xff]   ;;  %v4173_v2 = vld [vmem:[%s5145_s2 + $0x10] sm:$0xff]   ;;  %s99_s25 = sld [smem:[#allocation2]]  ;;  %s3042_s19 = sld [smem:[#allocation2 + $0x1]]  ;;  %vm4071_vm0 = vmmov 0  }
  0x17   :  { %3468 = vmatprep.subr.bf16.mxu0 %v4163_v0  ;;  %v4179_v3 = vld [vmem:[%s5144_s1] sm:$0xff]   ;;  %v4187_v4 = vld [vmem:[%s5145_s2 + $0x18] sm:$0xff]   ;;  %v3952_v7 = vld [vmem:[%s5147_s4 + $0x8] sm:$0xff]   ;;  %v294_v30 = vunpack.c.l.bf16 %v4163_v0  ;;  %v296_v31 = vunpack.c.l.bf16 %v4168_v1  ;;  %v297_v33 = vunpack.c.h.bf16 %v4168_v1  ;;  %v295_v34 = vunpack.c.h.bf16 %v4163_v0  ;;  %s3099_s27 = sld [smem:[#allocation2 + $0x2]] }
  0x18   :  { %3469 = vmatpush3.bf16.msra.mxu0 %v4163_v0  ;;  %3484 = vmatprep.mubr.bf16.mxu0 %v4179_v3  ;;  %v4194_v5 = vld [vmem:[%s5145_s2 + $0x20] sm:$0xff]   ;;  %v4207_v8 = vld [vmem:[%s5145_s2 + $0x28] sm:$0xff]   ;;  %v3953_v9 = vld [vmem:[%s5147_s4 + $0x10] sm:$0xff]   ;;  %v300_v46 = vunpack.c.l.bf16 %v4187_v4  ;;  %v301_v47 = vunpack.c.h.bf16 %v4187_v4  ;;  %v298_v49 = vunpack.c.l.bf16 %v4173_v2  ;;  %v299_v50 = vunpack.c.h.bf16 %v4173_v2 }
  0x19   :  { %3470 = vmatprep.subr.bf16.mxu0 %v4168_v1  ;;  %v3951_v6 = vld [vmem:[%s5147_s4] sm:$0xff]   ;;  %v4216_v10 = vld [vmem:[%s5145_s2 + $0x30] sm:$0xff]   ;;  %v3954_v11 = vld [vmem:[%s5147_s4 + $0x18] sm:$0xff]   ;;  %v304_v63 = vunpack.c.l.bf16 %v4207_v8  ;;  %v305_v0 = vunpack.c.h.bf16 %v4207_v8 }
  0x1a   :  { %3500 = vmatprep.subr.bf16.mxu1 %v3951_v6  ;;  %v4226_v12 = vld [vmem:[%s5145_s2 + $0x38] sm:$0xff]   ;;  %v3955_v13 = vld [vmem:[%s5147_s4 + $0x20] sm:$0xff]   ;;  %v3956_v14 = vld [vmem:[%s5147_s4 + $0x28] sm:$0xff]  }
  0x1b   :  { %3501 = vmatpush3.bf16.msra.mxu1 %v3951_v6  ;;  %v4242_v15 = vld [vmem:[%s5144_s1 + $0x8] sm:$0xff]   ;;  %v4247_v16 = vld [vmem:[%s5144_s1 + $0x10] sm:$0xff]   ;;  %v4255_v17 = vld [vmem:[%s5144_s1 + $0x18] sm:$0xff]   ;;  %v303_v6 = vunpack.c.h.bf16 %v4194_v5 }
  0x1c   :  { %3471 = vmatpush3.bf16.msra.mxu0 %v4168_v1  ;;  %3502 = vmatprep.subr.bf16.mxu1 %v3952_v7  ;;  %v4260_v18 = vld [vmem:[%s5144_s1 + $0x20] sm:$0xff]   ;;  %v4267_v19 = vld [vmem:[%s5144_s1 + $0x28] sm:$0xff]   ;;  %v4272_v20 = vld [vmem:[%s5144_s1 + $0x30] sm:$0xff]   ;;  %s293_s26 = sadd.f32 1.0, %s99_s25 }
  0x1d   :  { %3472 = vmatprep.subr.bf16.mxu0 %v4173_v2  ;;  %v4279_v21 = vld [vmem:[%s5144_s1 + $0x38] sm:$0xff]   ;;  %v3957_v22 = vld [vmem:[%s5147_s4 + $0x30] sm:$0xff]   ;;  %v3959_v24 = vld [vmem:[%s5149_s6] sm:$0xff]   ;;  %s895_s20 = sadd.f32 1.0, %s3042_s19 }
  0x1e   :  { %v3958_v23 = vld [vmem:[%s5147_s4 + $0x38] sm:$0xff]   ;;  %v3960_v25 = vld [vmem:[%s5149_s6 + $0x8] sm:$0xff]   ;;  %v3961_v26 = vld [vmem:[%s5149_s6 + $0x10] sm:$0xff]   ;;  %v4308_v32 = vstv %s293_s26  ;;  %s1503_s28 = sadd.f32 1.0, %s3099_s27 }
  0x1f   :  { %3503 = vmatpush3.bf16.msra.mxu1 %v3952_v7  ;;  %v3962_v27 = vld [vmem:[%s5149_s6 + $0x18] sm:$0xff]   ;;  %v3963_v28 = vld [vmem:[%s5149_s6 + $0x20] sm:$0xff]   ;;  %v3964_v29 = vld [vmem:[%s5149_s6 + $0x28] sm:$0xff]   ;;  %v311_v35 = vmul.f32 %v4308_v32, %v294_v30  ;;  %v313_v36 = vmul.f32 %v4308_v32, %v296_v31  ;;  %v314_v37 = vmul.f32 %v4308_v32, %v297_v33  ;;  %v312_v39 = vmul.f32 %v4308_v32, %v295_v34 }
  0x20   :  { %3473 = vmatpush3.bf16.msra.mxu0 %v4173_v2  ;;  %3504 = vmatprep.subr.bf16.mxu1 %v3953_v9  ;;  %v317_v53 = vmul.f32 %v4308_v32, %v300_v46  ;;  %v318_v54 = vmul.f32 %v4308_v32, %v301_v47  ;;  %v315_v56 = vmul.f32 %v4308_v32, %v298_v49  ;;  %v306_v31 = vunpack.c.l.bf16 %v4216_v10  ;;  %v3022_v49 = vld [vmem:[%s5148_s5] ss:$0 sm:$0xff] }
  0x21   :  { %3474 = vmatprep.subr.bf16.mxu0 %v4187_v4  ;;  %v316_v57 = vmul.f32 %v4308_v32, %v299_v50  ;;  %v307_v33 = vunpack.c.h.bf16 %v4216_v10 }
  0x23   :  { %3505 = vmatpush3.bf16.msra.mxu1 %v3953_v9 }
  0x24   :  { %3475 = vmatpush3.bf16.msra.mxu0 %v4187_v4  ;;  %3506 = vmatprep.subr.bf16.mxu1 %v3954_v11  ;;  %v302_v4 = vunpack.c.l.bf16 %v4194_v5 }
  0x25   :  { %3476 = vmatprep.subr.bf16.mxu0 %v4194_v5 }
  0x27   :  { %3507 = vmatpush3.bf16.msra.mxu1 %v3954_v11  ;;  %v321_v11 = vmul.f32 %v4308_v32, %v304_v63 }
  0x28   :  { %3477 = vmatpush3.bf16.msra.mxu0 %v4194_v5  ;;  %3508 = vmatprep.subr.bf16.mxu1 %v3955_v13  ;;  %v308_v5 = vunpack.c.l.bf16 %v4226_v12 }
  0x29   :  { %3478 = vmatprep.subr.bf16.mxu0 %v4207_v8 }
  0x2b   :  { %3509 = vmatpush3.bf16.msra.mxu1 %v3955_v13  ;;  %v322_v13 = vmul.f32 %v4308_v32, %v305_v0 }
  0x2c   :  { %3479 = vmatpush3.bf16.msra.mxu0 %v4207_v8  ;;  %3510 = vmatprep.subr.bf16.mxu1 %v3956_v14 }
  0x2d   :  { %3480 = vmatprep.subr.bf16.mxu0 %v4216_v10 }
  0x2f   :  { %3511 = vmatpush3.bf16.msra.mxu1 %v3956_v14 }
  0x30   :  { %3481 = vmatpush3.bf16.msra.mxu0 %v4216_v10  ;;  %3512 = vmatprep.subr.bf16.mxu1 %v3957_v22 }
  0x31   :  { %3482 = vmatprep.subr.bf16.mxu0 %v4226_v12 }
  0x33   :  { %3513 = vmatpush3.bf16.msra.mxu1 %v3957_v22  ;;  %v319_v22 = vmul.f32 %v4308_v32, %v302_v4 }
  0x34   :  { %3483 = vmatpush3.bf16.msra.mxu0 %v4226_v12  ;;  %3514 = vmatprep.subr.bf16.mxu1 %v3958_v23 }
  0x35   :  { %3532 = vmatprep.subr.bf16.mxu0 %v3959_v24 }
  0x37   :  { %3485 = vmatmul.mubr.bf16.vlgmr.msra.gmra.mrb[0].mxu0 %v4242_v15  ;;  %3515 = vmatpush3.bf16.msra.mxu1 %v3958_v23  ;;  %v320_v23 = vmul.f32 %v4308_v32, %v303_v6 }
  0x38   :  { %3488 = vmatprep.mubr.bf16.mxu0 %v4247_v16  ;;  %3533 = vmatpush3.bf16.msra.mxu0 %v3959_v24 }
  0x39   :  { %3534 = vmatprep.subr.bf16.mxu0 %v3960_v25 }
  0x3c   :  { %3535 = vmatpush3.bf16.msra.mxu0 %v3960_v25 }
  0x3d   :  { %3536 = vmatprep.subr.bf16.mxu0 %v3961_v26 }
  0x3f   :  { %3489 = vmatmul.mubr.bf16.gmra.mrb[4].mxu0 %v4255_v17 }
  0x40   :  { %3492 = vmatprep.mubr.bf16.mxu0 %v4260_v18  ;;  %3537 = vmatpush3.bf16.msra.mxu0 %v3961_v26 }
  0x41   :  { %3538 = vmatprep.subr.bf16.mxu0 %v3962_v27 }
  0x44   :  { %3539 = vmatpush3.bf16.msra.mxu0 %v3962_v27 }
  0x45   :  { %3540 = vmatprep.subr.bf16.mxu0 %v3963_v28 }
  0x47   :  { %3493 = vmatmul.mubr.bf16.gmra.mrb[8].mxu0 %v4267_v19 }
  0x48   :  { %3496 = vmatprep.mubr.bf16.mxu0 %v4272_v20  ;;  %3541 = vmatpush3.bf16.msra.mxu0 %v3963_v28  ;;  %v309_v28 = vunpack.c.h.bf16 %v4226_v12 }
  0x49   :  { %3542 = vmatprep.subr.bf16.mxu0 %v3964_v29 }
  0x4c   :  { %3543 = vmatpush3.bf16.msra.mxu0 %v3964_v29 }
  0x4f   :  { %3497 = vmatmul.mubr.bf16.gmra.mrb[12].mxu0 %v4279_v21 }
 0x10a   :  { %v3486_v38 = vpop.f32.mrb[0].mxu0 }
 0x10b   :  { %v230_v40 = vpop.f32.mrb[1].mxu0  ;;  %v329_v43 = vadd.f32 %v3486_v38, %v313_v36  ;;  %v325_v36 = vmul.f32 %v4308_v32, %v308_v5 }
 0x10c   :  { %v327_v41 = vadd.f32 %v311_v35, %v230_v40  ;;  %v3487_v42 = vpop.f32.mrb[2].mxu0  ;;  %v324_v40 = vmul.f32 %v4308_v32, %v307_v33 }
 0x10d   :  { %v330_v44 = vadd.f32 %v3487_v42, %v314_v37  ;;  %v233_v45 = vpop.f32.mrb[3].mxu0  ;;  %v326_v37 = vmul.f32 %v4308_v32, %v309_v28 }
 0x10e   :  { %v328_v48 = vadd.f32 %v312_v39, %v233_v45  ;;  %v323_v39 = vmul.f32 %v4308_v32, %v306_v31  ;;  %v3966_v32 = vld [vmem:[%s5149_s6 + $0x38] sm:$0xff]  }
 0x10f   :  { %v344_v51 = vpack.c.bf16 %v330_v44, %v329_v43 }
 0x110   :  { %v343_v52 = vpack.c.bf16 %v328_v48, %v327_v41  ;;  %v3965_v48 = vld [vmem:[%s5149_s6 + $0x30] sm:$0xff]  }
 0x111   :  { %3544 = vmatprep.subr.bf16.mxu0 %v3965_v48 }
 0x112   :  { %v3490_v55 = vpop.f32.mrb[4].mxu0  ;;  %3516 = vmatprep.mubr.bf16.mxu1 %v343_v52  ;;  %3545 = vmatpush3.bf16.msra.mxu0 %v3965_v48 }
 0x113   :  { %v246_v58 = vpop.f32.mrb[5].mxu0  ;;  %3517 = vmatmul.mubr.bf16.vlgmr.msra.gmra.mrb[0].mxu1 %v344_v51  ;;  %v333_v60 = vadd.f32 %v3490_v55, %v317_v53  ;;  %3546 = vmatprep.subr.bf16.mxu0 %v3966_v32 }
 0x114   :  { %v3491_v59 = vpop.f32.mrb[6].mxu0  ;;  %v331_v1 = vadd.f32 %v315_v56, %v246_v58 }
 0x115   :  { %v334_v61 = vadd.f32 %v3491_v59, %v318_v54  ;;  %v249_v62 = vpop.f32.mrb[7].mxu0 }
 0x116   :  { %v332_v2 = vadd.f32 %v316_v57, %v249_v62  ;;  %3547 = vmatpush3.bf16.msra.mxu0 %v3966_v32 }
 0x117   :  { %v346_v7 = vpack.c.bf16 %v334_v61, %v333_v60 }
 0x118   :  { %v345_v9 = vpack.c.bf16 %v332_v2, %v331_v1 }
 0x11a   :  { %v3494_v14 = vpop.f32.mrb[8].mxu0  ;;  %3520 = vmatprep.mubr.bf16.mxu1 %v345_v9 }
 0x11b   :  { %v262_v24 = vpop.f32.mrb[9].mxu0  ;;  %3521 = vmatmul.mubr.bf16.gmra.mrb[4].mxu1 %v346_v7  ;;  %v337_v25 = vadd.f32 %v3494_v14, %v321_v11 }
 0x11c   :  { %v3495_v8 = vpop.f32.mrb[10].mxu0  ;;  %v335_v29 = vadd.f32 %v319_v22, %v262_v24 }
 0x11d   :  { %v338_v26 = vadd.f32 %v3495_v8, %v322_v13  ;;  %v265_v27 = vpop.f32.mrb[11].mxu0 }
 0x11e   :  { %v336_v30 = vadd.f32 %v320_v23, %v265_v27 }
 0x11f   :  { %v348_v34 = vpack.c.bf16 %v338_v26, %v337_v25 }
 0x120   :  { %v347_v35 = vpack.c.bf16 %v336_v30, %v335_v29 }
 0x122   :  { %v3498_v38 = vpop.f32.mrb[12].mxu0  ;;  %3524 = vmatprep.mubr.bf16.mxu1 %v347_v35 }
 0x123   :  { %v278_v41 = vpop.f32.mrb[13].mxu0  ;;  %3525 = vmatmul.mubr.bf16.gmra.mrb[8].mxu1 %v348_v34  ;;  %v341_v42 = vadd.f32 %v3498_v38, %v325_v36 }
 0x124   :  { %v3499_v12 = vpop.f32.mrb[14].mxu0  ;;  %v339_v45 = vadd.f32 %v323_v39, %v278_v41 }
 0x125   :  { %v342_v43 = vadd.f32 %v3499_v12, %v326_v37  ;;  %v281_v44 = vpop.f32.mrb[15].mxu0 }
 0x126   :  { %v340_v10 = vadd.f32 %v324_v40, %v281_v44 }
 0x127   :  { %v350_v46 = vpack.c.bf16 %v342_v43, %v341_v42 }
 0x128   :  { %v349_v47 = vpack.c.bf16 %v340_v10, %v339_v45 }
 0x12a   :  { %3528 = vmatprep.mubr.bf16.mxu1 %v349_v47 }
 0x12b   :  { %3529 = vmatmul.mubr.bf16.gmra.mrb[12].mxu1 %v350_v46 }
 0x12c   :  { %3580 = vmatprep.mubr.bf16.mxu1 %v4179_v3 }
 0x1e6   :  { %v3518_v50 = vpop.f32.mrb[0].mxu1 }
 0x1e7   :  { %v465_v51 = vadd.f32 %v3518_v50, %v3022_v49  ;;  %v456_v52 = vpop.f32.mrb[1].mxu1  ;;  %v3967_v50 = vld [vmem:[%s5147_s4 + $0x40] sm:$0xff]  }
 0x1e8   :  { %v457_v3 = vadd.f32 %v3022_v49, %v456_v52  ;;  %v3519_v53 = vpop.f32.mrb[2].mxu1  ;;  %3596 = vmatprep.subr.bf16.mxu0 %v3967_v50  ;;  %v3970_v52 = vld [vmem:[%s5147_s4 + $0x58] sm:$0xff]  }
 0x1e9   :  { %v468_v54 = vadd.f32 %v3519_v53, %v3022_v49  ;;  %v459_v55 = vpop.f32.mrb[3].mxu1  ;;  %v521_v57 = vmax.f32 %v465_v51, 0.0  ;;  %v3968_v51 = vld [vmem:[%s5147_s4 + $0x48] sm:$0xff]  }
 0x1ea   :  { %v460_v56 = vadd.f32 %v3022_v49, %v459_v55  ;;  %v519_v59 = vmax.f32 %v457_v3, 0.0  ;;  %v3971_v3 = vld [vmem:[%s5147_s4 + $0x60] sm:$0xff]   ;;  %v3972_v53 = vld [vmem:[%s5147_s4 + $0x68] sm:$0xff]  }
 0x1eb   :  { %v522_v58 = vmax.f32 %v468_v54, 0.0  ;;  %v4371_v54 = vld [vmem:[%s5150_s7] ss:$0 sm:$0xff] }
 0x1ec   :  { %v520_v60 = vmax.f32 %v460_v56, 0.0 }
 0x1ed   :  { %v536_v61 = vpack.c.bf16 %v522_v58, %v521_v57  ;;  %v4377_v58 = vld [vmem:[%s5151_s8] ss:$0 sm:$0xff] }
 0x1ee   :  { %v535_v62 = vpack.c.bf16 %v520_v60, %v519_v59  ;;  %v3522_v63 = vpop.f32.mrb[4].mxu1 }
 0x1ef   :  { %v481_v0 = vadd.f32 %v3522_v63, %v3022_v49  ;;  %v472_v1 = vpop.f32.mrb[5].mxu1 }
 0x1f0   :  { %v473_v2 = vadd.f32 %v3022_v49, %v472_v1  ;;  %v3523_v4 = vpop.f32.mrb[6].mxu1  ;;  %3548 = vmatprep.mubr.bf16.mxu0 %v535_v62 }
 0x1f1   :  { %v484_v6 = vadd.f32 %v3523_v4, %v3022_v49  ;;  %v475_v7 = vpop.f32.mrb[7].mxu1  ;;  %3549 = vmatmul.mubr.bf16.vlgmr.msra.gmra.mrb[16].mxu0 %v536_v61  ;;  %v525_v11 = vmax.f32 %v481_v0, 0.0  ;;  %v4384_v0 = vld [vmem:[%s5152_s9] ss:$0 sm:$0xff] }
 0x1f2   :  { %v476_v9 = vadd.f32 %v3022_v49, %v475_v7  ;;  %v523_v14 = vmax.f32 %v473_v2, 0.0  ;;  %3597 = vmatpush3.bf16.msra.mxu0 %v3967_v50 }
 0x1f3   :  { %v526_v13 = vmax.f32 %v484_v6, 0.0  ;;  %3598 = vmatprep.subr.bf16.mxu0 %v3968_v51 }
 0x1f4   :  { %v524_v22 = vmax.f32 %v476_v9, 0.0 }
 0x1f5   :  { %v538_v23 = vpack.c.bf16 %v526_v13, %v525_v11 }
 0x1f6   :  { %v537_v24 = vpack.c.bf16 %v524_v22, %v523_v14  ;;  %v3526_v8 = vpop.f32.mrb[8].mxu1  ;;  %3599 = vmatpush3.bf16.msra.mxu0 %v3968_v51 }
 0x1f7   :  { %v497_v25 = vadd.f32 %v3526_v8, %v3022_v49  ;;  %v488_v26 = vpop.f32.mrb[9].mxu1 }
 0x1f8   :  { %v489_v27 = vadd.f32 %v3022_v49, %v488_v26  ;;  %v3527_v5 = vpop.f32.mrb[10].mxu1  ;;  %3552 = vmatprep.mubr.bf16.mxu0 %v537_v24 }
 0x1f9   :  { %v500_v28 = vadd.f32 %v3527_v5, %v3022_v49  ;;  %v491_v29 = vpop.f32.mrb[11].mxu1  ;;  %3553 = vmatmul.mubr.bf16.gmra.mrb[20].mxu0 %v538_v23  ;;  %v529_v31 = vmax.f32 %v497_v25, 0.0 }
 0x1fa   :  { %v492_v30 = vadd.f32 %v3022_v49, %v491_v29  ;;  %v527_v34 = vmax.f32 %v489_v27, 0.0 }
 0x1fb   :  { %v530_v33 = vmax.f32 %v500_v28, 0.0 }
 0x1fc   :  { %v528_v35 = vmax.f32 %v492_v30, 0.0 }
 0x1fd   :  { %v540_v36 = vpack.c.bf16 %v530_v33, %v529_v31 }
 0x1fe   :  { %v539_v37 = vpack.c.bf16 %v528_v35, %v527_v34  ;;  %v3530_v38 = vpop.f32.mrb[12].mxu1 }
 0x1ff   :  { %v513_v39 = vadd.f32 %v3530_v38, %v3022_v49  ;;  %v504_v40 = vpop.f32.mrb[13].mxu1 }
 0x200   :  { %v505_v41 = vadd.f32 %v3022_v49, %v504_v40  ;;  %v3531_v12 = vpop.f32.mrb[14].mxu1  ;;  %3556 = vmatprep.mubr.bf16.mxu0 %v539_v37 }
 0x201   :  { %v516_v42 = vadd.f32 %v3531_v12, %v3022_v49  ;;  %v507_v43 = vpop.f32.mrb[15].mxu1  ;;  %3557 = vmatmul.mubr.bf16.gmra.mrb[24].mxu0 %v540_v36  ;;  %v533_v45 = vmax.f32 %v513_v39, 0.0 }
 0x202   :  { %v508_v44 = vadd.f32 %v3022_v49, %v507_v43  ;;  %v531_v46 = vmax.f32 %v505_v41, 0.0  ;;  %v3969_v49 = vld [vmem:[%s5147_s4 + $0x50] sm:$0xff]  }
 0x203   :  { %v534_v10 = vmax.f32 %v516_v42, 0.0  ;;  %3600 = vmatprep.subr.bf16.mxu0 %v3969_v49 }
 0x204   :  { %v532_v47 = vmax.f32 %v508_v44, 0.0  ;;  %3601 = vmatpush3.bf16.msra.mxu0 %v3969_v49 }
 0x205   :  { %v542_v48 = vpack.c.bf16 %v534_v10, %v533_v45  ;;  %3602 = vmatprep.subr.bf16.mxu0 %v3970_v52 }
 0x206   :  { %v541_v32 = vpack.c.bf16 %v532_v47, %v531_v46 }
 0x208   :  { %3560 = vmatprep.mubr.bf16.mxu0 %v541_v32  ;;  %3603 = vmatpush3.bf16.msra.mxu0 %v3970_v52 }
 0x209   :  { %3561 = vmatmul.mubr.bf16.gmra.mrb[28].mxu0 %v542_v48  ;;  %3604 = vmatprep.subr.bf16.mxu0 %v3971_v3 }
 0x20c   :  { %3605 = vmatpush3.bf16.msra.mxu0 %v3971_v3 }
 0x20d   :  { %3606 = vmatprep.subr.bf16.mxu0 %v3972_v53 }
 0x210   :  { %3607 = vmatpush3.bf16.msra.mxu0 %v3972_v53 }
 0x2c4   :  { %v3550_v55 = vpop.f32.mrb[16].mxu0 }
 0x2c5   :  { %v657_v56 = vadd.f32 %v3550_v55, %v4371_v54  ;;  %v648_v57 = vpop.f32.mrb[17].mxu0 }
 0x2c6   :  { %v649_v59 = vadd.f32 %v4371_v54, %v648_v57  ;;  %v3551_v60 = vpop.f32.mrb[18].mxu0 }
 0x2c7   :  { %v713_v61 = vmax.f32 %v657_v56, 0.0  ;;  %v660_v62 = vadd.f32 %v3551_v60, %v4371_v54  ;;  %v651_v63 = vpop.f32.mrb[19].mxu0 }
 0x2c8   :  { %v711_v1 = vmax.f32 %v649_v59, 0.0  ;;  %v652_v2 = vadd.f32 %v4371_v54, %v651_v63 }
 0x2c9   :  { %v736_v4 = vmul.f32 %v4377_v58, %v713_v61  ;;  %v714_v6 = vmax.f32 %v660_v62, 0.0 }
 0x2ca   :  { %v734_v7 = vmul.f32 %v4377_v58, %v711_v1  ;;  %v712_v9 = vmax.f32 %v652_v2, 0.0 }
 0x2cb   :  { %v759_v11 = vadd.f32 %v4384_v0, %v736_v4  ;;  %v737_v13 = vmul.f32 %v4377_v58, %v714_v6 }
 0x2cc   :  { %v757_v14 = vadd.f32 %v4384_v0, %v734_v7  ;;  %v735_v22 = vmul.f32 %v4377_v58, %v712_v9  ;;  %v3554_v23 = vpop.f32.mrb[20].mxu0 }
 0x2cd   :  { %v760_v24 = vadd.f32 %v4384_v0, %v737_v13  ;;  %v673_v8 = vadd.f32 %v3554_v23, %v4371_v54  ;;  %v664_v25 = vpop.f32.mrb[21].mxu0  ;;  %v775_v28 = vmax.f32 %v759_v11, 0.0 }
 0x2ce   :  { %v758_v26 = vadd.f32 %v4384_v0, %v735_v22  ;;  %v665_v27 = vadd.f32 %v4371_v54, %v664_v25  ;;  %v3555_v5 = vpop.f32.mrb[22].mxu0  ;;  %v773_v34 = vmax.f32 %v757_v14, 0.0 }
 0x2cf   :  { %v776_v29 = vmax.f32 %v760_v24, 0.0  ;;  %v717_v30 = vmax.f32 %v673_v8, 0.0  ;;  %v676_v31 = vadd.f32 %v3555_v5, %v4371_v54  ;;  %v667_v33 = vpop.f32.mrb[23].mxu0 }
 0x2d0   :  { %v774_v35 = vmax.f32 %v758_v26, 0.0  ;;  %v715_v36 = vmax.f32 %v665_v27, 0.0  ;;  %v668_v37 = vadd.f32 %v4371_v54, %v667_v33 }
 0x2d1   :  { %v740_v38 = vmul.f32 %v4377_v58, %v717_v30  ;;  %v718_v39 = vmax.f32 %v676_v31, 0.0  ;;  %v4400_v40 = vpack.c.bf16 %v776_v29, %v775_v28 }
 0x2d2   :  { %v738_v41 = vmul.f32 %v4377_v58, %v715_v36  ;;  %v716_v12 = vmax.f32 %v668_v37, 0.0  ;;  %v4403_v42 = vpack.c.bf16 %v774_v35, %v773_v34 }
 0x2d3   :  { %v763_v43 = vadd.f32 %v4384_v0, %v740_v38  ;;  %v741_v44 = vmul.f32 %v4377_v58, %v718_v39 }
 0x2d4   :  { %v761_v45 = vadd.f32 %v4384_v0, %v738_v41  ;;  %v739_v10 = vmul.f32 %v4377_v58, %v716_v12  ;;  %v3558_v46 = vpop.f32.mrb[24].mxu0  ;;  %3564 = vmatprep.subr.bf16.mxu1 %v4403_v42 }
 0x2d5   :  { %v764_v47 = vadd.f32 %v4384_v0, %v741_v44  ;;  %v689_v48 = vadd.f32 %v3558_v46, %v4371_v54  ;;  %v680_v32 = vpop.f32.mrb[25].mxu0  ;;  %3565 = vmatpush3.bf16.msra.mxu1 %v4403_v42  ;;  %v779_v52 = vmax.f32 %v763_v43, 0.0 }
 0x2d6   :  { %v762_v50 = vadd.f32 %v4384_v0, %v739_v10  ;;  %v681_v51 = vadd.f32 %v4371_v54, %v680_v32  ;;  %v3559_v49 = vpop.f32.mrb[26].mxu0  ;;  %3566 = vmatprep.subr.bf16.mxu1 %v4400_v40  ;;  %v777_v57 = vmax.f32 %v761_v45, 0.0 }
 0x2d7   :  { %v780_v3 = vmax.f32 %v764_v47, 0.0  ;;  %v721_v53 = vmax.f32 %v689_v48, 0.0  ;;  %v692_v55 = vadd.f32 %v3559_v49, %v4371_v54  ;;  %v683_v56 = vpop.f32.mrb[27].mxu0 }
 0x2d8   :  { %v778_v59 = vmax.f32 %v762_v50, 0.0  ;;  %v719_v60 = vmax.f32 %v681_v51, 0.0  ;;  %v684_v61 = vadd.f32 %v4371_v54, %v683_v56 }
 0x2d9   :  { %v744_v62 = vmul.f32 %v4377_v58, %v721_v53  ;;  %v722_v63 = vmax.f32 %v692_v55, 0.0  ;;  %3567 = vmatpush3.bf16.msra.mxu1 %v4400_v40  ;;  %v4420_v1 = vpack.c.bf16 %v780_v3, %v779_v52  ;;  %v4495_v52 = vstv %s895_s20 }
 0x2da   :  { %v742_v2 = vmul.f32 %v4377_v58, %v719_v60  ;;  %v720_v4 = vmax.f32 %v684_v61, 0.0  ;;  %v4423_v6 = vpack.c.bf16 %v778_v59, %v777_v57  ;;  %v896_v3 = vunpack.c.l.bf16 %v4403_v42 }
 0x2db   :  { %v767_v7 = vadd.f32 %v4384_v0, %v744_v62  ;;  %v745_v9 = vmul.f32 %v4377_v58, %v722_v63  ;;  %v899_v53 = vunpack.c.h.bf16 %v4400_v40  ;;  %v897_v55 = vunpack.c.h.bf16 %v4403_v42 }
 0x2dc   :  { %v765_v11 = vadd.f32 %v4384_v0, %v742_v2  ;;  %v743_v13 = vmul.f32 %v4377_v58, %v720_v4  ;;  %v3562_v14 = vpop.f32.mrb[28].mxu0  ;;  %3568 = vmatprep.subr.bf16.mxu1 %v4423_v6  ;;  %v913_v59 = vmul.f32 %v4495_v52, %v896_v3  ;;  %v900_v42 = vunpack.c.l.bf16 %v4423_v6 }
 0x2dd   :  { %v768_v22 = vadd.f32 %v4384_v0, %v745_v9  ;;  %v705_v23 = vadd.f32 %v3562_v14, %v4371_v54  ;;  %v696_v24 = vpop.f32.mrb[29].mxu0  ;;  %3569 = vmatpush3.bf16.msra.mxu1 %v4423_v6  ;;  %v783_v27 = vmax.f32 %v767_v7, 0.0  ;;  %v916_v62 = vmul.f32 %v4495_v52, %v899_v53 }
 0x2de   :  { %v766_v8 = vadd.f32 %v4384_v0, %v743_v13  ;;  %v697_v25 = vadd.f32 %v4371_v54, %v696_v24  ;;  %v3563_v26 = vpop.f32.mrb[30].mxu0  ;;  %3570 = vmatprep.subr.bf16.mxu1 %v4420_v1  ;;  %v781_v31 = vmax.f32 %v765_v11, 0.0  ;;  %v914_v4 = vmul.f32 %v4495_v52, %v897_v55 }
 0x2df   :  { %v784_v5 = vmax.f32 %v768_v22, 0.0  ;;  %v725_v28 = vmax.f32 %v705_v23, 0.0  ;;  %v708_v29 = vadd.f32 %v3563_v26, %v4371_v54  ;;  %v699_v30 = vpop.f32.mrb[31].mxu0  ;;  %v902_v11 = vunpack.c.l.bf16 %v4420_v1 }
 0x2e0   :  { %v782_v33 = vmax.f32 %v766_v8, 0.0  ;;  %v723_v34 = vmax.f32 %v697_v25, 0.0  ;;  %v700_v35 = vadd.f32 %v4371_v54, %v699_v30  ;;  %v903_v14 = vunpack.c.h.bf16 %v4420_v1 }
 0x2e1   :  { %v748_v36 = vmul.f32 %v4377_v58, %v725_v28  ;;  %v726_v37 = vmax.f32 %v708_v29, 0.0  ;;  %3571 = vmatpush3.bf16.msra.mxu1 %v4420_v1  ;;  %v4440_v38 = vpack.c.bf16 %v784_v5, %v783_v27  ;;  %v901_v23 = vunpack.c.h.bf16 %v4423_v6 }
 0x2e2   :  { %v746_v39 = vmul.f32 %v4377_v58, %v723_v34  ;;  %v724_v41 = vmax.f32 %v700_v35, 0.0  ;;  %v4443_v12 = vpack.c.bf16 %v782_v33, %v781_v31  ;;  %v919_v24 = vmul.f32 %v4495_v52, %v902_v11 }
 0x2e3   :  { %v771_v43 = vadd.f32 %v4384_v0, %v748_v36  ;;  %v749_v44 = vmul.f32 %v4377_v58, %v726_v37  ;;  %v917_v25 = vmul.f32 %v4495_v52, %v900_v42  ;;  %v920_v5 = vmul.f32 %v4495_v52, %v903_v14 }
 0x2e4   :  { %v769_v45 = vadd.f32 %v4384_v0, %v746_v39  ;;  %v747_v54 = vmul.f32 %v4377_v58, %v724_v41  ;;  %3572 = vmatprep.subr.bf16.mxu1 %v4443_v12  ;;  %v3973_v58 = vld [vmem:[%s5147_s4 + $0x70] sm:$0xff]   ;;  %v918_v30 = vmul.f32 %v4495_v52, %v901_v23  ;;  %v906_v33 = vunpack.c.l.bf16 %v4440_v38 }
 0x2e5   :  { %v772_v10 = vadd.f32 %v4384_v0, %v749_v44  ;;  %3573 = vmatpush3.bf16.msra.mxu1 %v4443_v12  ;;  %v787_v47 = vmax.f32 %v771_v43, 0.0  ;;  %3608 = vmatprep.subr.bf16.mxu0 %v3973_v58  ;;  %v904_v34 = vunpack.c.l.bf16 %v4443_v12  ;;  %v907_v36 = vunpack.c.h.bf16 %v4440_v38 }
 0x2e6   :  { %v770_v46 = vadd.f32 %v4384_v0, %v747_v54  ;;  %3574 = vmatprep.subr.bf16.mxu1 %v4440_v38  ;;  %v785_v32 = vmax.f32 %v769_v45, 0.0  ;;  %3609 = vmatpush3.bf16.msra.mxu0 %v3973_v58  ;;  %v898_v0 = vunpack.c.l.bf16 %v4400_v40  ;;  %v905_v39 = vunpack.c.h.bf16 %v4443_v12 }
 0x2e7   :  { %v788_v48 = vmax.f32 %v772_v10, 0.0  ;;  %v923_v41 = vmul.f32 %v4495_v52, %v906_v33  ;;  %v921_v44 = vmul.f32 %v4495_v52, %v904_v34  ;;  %v924_v10 = vmul.f32 %v4495_v52, %v907_v36 }
 0x2e8   :  { %v786_v50 = vmax.f32 %v770_v46, 0.0  ;;  %v915_v56 = vmul.f32 %v4495_v52, %v898_v0 }
 0x2e9   :  { %3575 = vmatpush3.bf16.msra.mxu1 %v4440_v38  ;;  %v4455_v51 = vpack.c.bf16 %v788_v48, %v787_v47  ;;  %v922_v48 = vmul.f32 %v4495_v52, %v905_v39 }
 0x2ea   :  { %v4457_v49 = vpack.c.bf16 %v786_v50, %v785_v32 }
 0x2eb   :  { %v910_v50 = vunpack.c.l.bf16 %v4455_v51 }
 0x2ec   :  { %3576 = vmatprep.subr.bf16.mxu1 %v4457_v49  ;;  %v908_v58 = vunpack.c.l.bf16 %v4457_v49 }
 0x2ed   :  { %3577 = vmatpush3.bf16.msra.mxu1 %v4457_v49 }
 0x2ee   :  { %3578 = vmatprep.subr.bf16.mxu1 %v4455_v51 }
 0x2f1   :  { %3579 = vmatpush3.bf16.msra.mxu1 %v4455_v51 }
 0x2f4   :  { %3581 = vmatmul.mubr.bf16.vlgmr.msra.gmra.mrb[16].mxu1 %v4242_v15  ;;  %v3974_v15 = vld [vmem:[%s5147_s4 + $0x78] sm:$0xff]  }
 0x2f5   :  { %3584 = vmatprep.mubr.bf16.mxu1 %v4247_v16  ;;  %3610 = vmatprep.subr.bf16.mxu0 %v3974_v15  ;;  %v3975_v16 = vld [vmem:[%s5149_s6 + $0x40] sm:$0xff]  }
 0x2f6   :  { %3611 = vmatpush3.bf16.msra.mxu0 %v3974_v15  ;;  %3628 = vmatprep.subr.bf16.mxu1 %v3975_v16 }
 0x2f7   :  { %3629 = vmatpush3.bf16.msra.mxu1 %v3975_v16  ;;  %v911_v16 = vunpack.c.h.bf16 %v4455_v51 }
 0x2f9   :  { %v928_v53 = vmul.f32 %v4495_v52, %v911_v16 }
 0x2fc   :  { %3585 = vmatmul.mubr.bf16.gmra.mrb[20].mxu1 %v4255_v17  ;;  %v3976_v17 = vld [vmem:[%s5149_s6 + $0x48] sm:$0xff]  }
 0x2fd   :  { %3588 = vmatprep.mubr.bf16.mxu1 %v4260_v18  ;;  %3630 = vmatprep.subr.bf16.mxu1 %v3976_v17  ;;  %v3977_v18 = vld [vmem:[%s5149_s6 + $0x50] sm:$0xff]  }
 0x2fe   :  { %3631 = vmatpush3.bf16.msra.mxu1 %v3976_v17 }
 0x2ff   :  { %3632 = vmatprep.subr.bf16.mxu1 %v3977_v18 }
 0x302   :  { %3633 = vmatpush3.bf16.msra.mxu1 %v3977_v18  ;;  %v909_v18 = vunpack.c.h.bf16 %v4457_v49 }
 0x304   :  { %3589 = vmatmul.mubr.bf16.gmra.mrb[24].mxu1 %v4267_v19  ;;  %v3978_v19 = vld [vmem:[%s5149_s6 + $0x58] sm:$0xff]  }
 0x305   :  { %3592 = vmatprep.mubr.bf16.mxu1 %v4272_v20  ;;  %3634 = vmatprep.subr.bf16.mxu1 %v3978_v19  ;;  %v3979_v20 = vld [vmem:[%s5149_s6 + $0x60] sm:$0xff]  }
 0x306   :  { %3635 = vmatpush3.bf16.msra.mxu1 %v3978_v19  ;;  %v927_v19 = vmul.f32 %v4495_v52, %v910_v50 }
 0x307   :  { %3636 = vmatprep.subr.bf16.mxu1 %v3979_v20 }
 0x30a   :  { %3637 = vmatpush3.bf16.msra.mxu1 %v3979_v20 }
 0x30c   :  { %3593 = vmatmul.mubr.bf16.gmra.mrb[28].mxu1 %v4279_v21  ;;  %v3980_v21 = vld [vmem:[%s5149_s6 + $0x68] sm:$0xff]  }
 0x30d   :  { %3638 = vmatprep.subr.bf16.mxu1 %v3980_v21 }
 0x30e   :  { %3639 = vmatpush3.bf16.msra.mxu1 %v3980_v21  ;;  %v925_v21 = vmul.f32 %v4495_v52, %v908_v58 }
 0x3c7   :  { %v3582_v57 = vpop.f32.mrb[16].mxu1 }
 0x3c8   :  { %v931_v60 = vadd.f32 %v3582_v57, %v915_v56  ;;  %v832_v61 = vpop.f32.mrb[17].mxu1  ;;  %v926_v57 = vmul.f32 %v4495_v52, %v909_v18  ;;  %v3982_v52 = vld [vmem:[%s5149_s6 + $0x78] sm:$0xff]  }
 0x3c9   :  { %v929_v63 = vadd.f32 %v913_v59, %v832_v61  ;;  %v3583_v2 = vpop.f32.mrb[18].mxu1 }
 0x3ca   :  { %v932_v7 = vadd.f32 %v3583_v2, %v916_v62  ;;  %v835_v9 = vpop.f32.mrb[19].mxu1  ;;  %v4531_v62 = vld [vmem:[%s5144_s1] sm:$0xff]  }
 0x3cb   :  { %v930_v40 = vadd.f32 %v914_v4, %v835_v9  ;;  %v3060_v2 = vld [vmem:[%s5148_s5 + $0x1] ss:$0 sm:$0xff] }
 0x3cc   :  { %v946_v13 = vpack.c.bf16 %v932_v7, %v931_v60 }
 0x3cd   :  { %v945_v22 = vpack.c.bf16 %v930_v40, %v929_v63  ;;  %v3981_v63 = vld [vmem:[%s5149_s6 + $0x70] sm:$0xff]  }
 0x3ce   :  { %3640 = vmatprep.subr.bf16.mxu1 %v3981_v63 }
 0x3cf   :  { %v3586_v8 = vpop.f32.mrb[20].mxu1  ;;  %3612 = vmatprep.mubr.bf16.mxu0 %v945_v22  ;;  %3641 = vmatpush3.bf16.msra.mxu1 %v3981_v63  ;;  %v3987_v63 = vld [vmem:[%s5147_s4 + $0xa0] sm:$0xff]  }
 0x3d0   :  { %v935_v26 = vadd.f32 %v3586_v8, %v919_v24  ;;  %v848_v27 = vpop.f32.mrb[21].mxu1  ;;  %3613 = vmatmul.mubr.bf16.vlgmr.msra.gmra.mrb[32].mxu0 %v946_v13  ;;  %3642 = vmatprep.subr.bf16.mxu1 %v3982_v52 }
 0x3d1   :  { %v933_v28 = vadd.f32 %v917_v25, %v848_v27  ;;  %v3587_v29 = vpop.f32.mrb[22].mxu1 }
 0x3d2   :  { %v936_v31 = vadd.f32 %v3587_v29, %v920_v5  ;;  %v851_v1 = vpop.f32.mrb[23].mxu1 }
 0x3d3   :  { %v934_v6 = vadd.f32 %v918_v30, %v851_v1  ;;  %3643 = vmatpush3.bf16.msra.mxu1 %v3982_v52  ;;  %v3988_v52 = vld [vmem:[%s5147_s4 + $0xa8] sm:$0xff]  }
 0x3d4   :  { %v948_v35 = vpack.c.bf16 %v936_v31, %v935_v26 }
 0x3d5   :  { %v947_v37 = vpack.c.bf16 %v934_v6, %v933_v28 }
 0x3d7   :  { %v3590_v43 = vpop.f32.mrb[24].mxu1  ;;  %3616 = vmatprep.mubr.bf16.mxu0 %v947_v37 }
 0x3d8   :  { %v939_v45 = vadd.f32 %v3590_v43, %v923_v41  ;;  %v864_v54 = vpop.f32.mrb[25].mxu1  ;;  %3617 = vmatmul.mubr.bf16.gmra.mrb[36].mxu0 %v948_v35 }
 0x3d9   :  { %v937_v46 = vadd.f32 %v921_v44, %v864_v54  ;;  %v3591_v47 = vpop.f32.mrb[26].mxu1 }
 0x3da   :  { %v940_v32 = vadd.f32 %v3591_v47, %v924_v10  ;;  %v867_v38 = vpop.f32.mrb[27].mxu1 }
 0x3db   :  { %v938_v12 = vadd.f32 %v922_v48, %v867_v38 }
 0x3dc   :  { %v950_v15 = vpack.c.bf16 %v940_v32, %v939_v45 }
 0x3dd   :  { %v949_v17 = vpack.c.bf16 %v938_v12, %v937_v46 }
 0x3df   :  { %v3594_v20 = vpop.f32.mrb[28].mxu1  ;;  %3620 = vmatprep.mubr.bf16.mxu0 %v949_v17 }
 0x3e0   :  { %v943_v0 = vadd.f32 %v3594_v20, %v927_v19  ;;  %v880_v3 = vpop.f32.mrb[29].mxu1  ;;  %3621 = vmatmul.mubr.bf16.gmra.mrb[40].mxu0 %v950_v15 }
 0x3e1   :  { %v941_v55 = vadd.f32 %v925_v21, %v880_v3  ;;  %v3595_v56 = vpop.f32.mrb[30].mxu1 }
 0x3e2   :  { %v944_v59 = vadd.f32 %v3595_v56, %v928_v53  ;;  %v883_v51 = vpop.f32.mrb[31].mxu1 }
 0x3e3   :  { %v942_v60 = vadd.f32 %v926_v57, %v883_v51  ;;  %v3983_v51 = vld [vmem:[%s5147_s4 + $0x80] sm:$0xff]  }
 0x3e4   :  { %v952_v61 = vpack.c.bf16 %v944_v59, %v943_v0  ;;  %3692 = vmatprep.subr.bf16.mxu1 %v3983_v51 }
 0x3e5   :  { %v951_v49 = vpack.c.bf16 %v942_v60, %v941_v55  ;;  %v3984_v60 = vld [vmem:[%s5147_s4 + $0x88] sm:$0xff]  }
 0x3e7   :  { %3624 = vmatprep.mubr.bf16.mxu0 %v951_v49  ;;  %v3986_v49 = vld [vmem:[%s5147_s4 + $0x98] sm:$0xff]  }
 0x3e8   :  { %3625 = vmatmul.mubr.bf16.gmra.mrb[44].mxu0 %v952_v61  ;;  %v3985_v61 = vld [vmem:[%s5147_s4 + $0x90] sm:$0xff]  }
 0x3e9   :  { %3676 = vmatprep.mubr.bf16.mxu0 %v4531_v62 }
 0x4a3   :  { %v3614_v4 = vpop.f32.mrb[32].mxu0 }
 0x4a4   :  { %v1069_v7 = vadd.f32 %v3614_v4, %v3060_v2  ;;  %v1060_v9 = vpop.f32.mrb[33].mxu0 }
 0x4a5   :  { %v1061_v11 = vadd.f32 %v3060_v2, %v1060_v9  ;;  %v3615_v40 = vpop.f32.mrb[34].mxu0 }
 0x4a6   :  { %v1072_v42 = vadd.f32 %v3615_v40, %v3060_v2  ;;  %v1063_v13 = vpop.f32.mrb[35].mxu0  ;;  %v1125_v22 = vmax.f32 %v1069_v7, 0.0 }
 0x4a7   :  { %v1064_v14 = vadd.f32 %v3060_v2, %v1063_v13  ;;  %v1123_v24 = vmax.f32 %v1061_v11, 0.0  ;;  %v4570_v11 = vld [vmem:[%s5151_s8 + $0x1] ss:$0 sm:$0xff] }
 0x4a8   :  { %v1126_v23 = vmax.f32 %v1072_v42, 0.0 }
 0x4a9   :  { %v1124_v8 = vmax.f32 %v1064_v14, 0.0 }
 0x4aa   :  { %v1140_v25 = vpack.c.bf16 %v1126_v23, %v1125_v22  ;;  %v4577_v23 = vld [vmem:[%s5152_s9 + $0x1] ss:$0 sm:$0xff] }
 0x4ab   :  { %v1139_v26 = vpack.c.bf16 %v1124_v8, %v1123_v24  ;;  %v3618_v27 = vpop.f32.mrb[36].mxu0 }
 0x4ac   :  { %v1085_v5 = vadd.f32 %v3618_v27, %v3060_v2  ;;  %v1076_v28 = vpop.f32.mrb[37].mxu0 }
 0x4ad   :  { %v1077_v29 = vadd.f32 %v3060_v2, %v1076_v28  ;;  %v3619_v30 = vpop.f32.mrb[38].mxu0  ;;  %3644 = vmatprep.mubr.bf16.mxu1 %v1139_v26 }
 0x4ae   :  { %v1088_v31 = vadd.f32 %v3619_v30, %v3060_v2  ;;  %v1079_v1 = vpop.f32.mrb[39].mxu0  ;;  %3645 = vmatmul.mubr.bf16.vlgmr.msra.gmra.mrb[32].mxu1 %v1140_v25  ;;  %v1129_v6 = vmax.f32 %v1085_v5, 0.0 }
 0x4af   :  { %v1080_v33 = vadd.f32 %v3060_v2, %v1079_v1  ;;  %v1127_v35 = vmax.f32 %v1077_v29, 0.0  ;;  %3693 = vmatpush3.bf16.msra.mxu1 %v3983_v51 }
 0x4b0   :  { %v1130_v34 = vmax.f32 %v1088_v31, 0.0  ;;  %3694 = vmatprep.subr.bf16.mxu1 %v3984_v60 }
 0x4b1   :  { %v1128_v36 = vmax.f32 %v1080_v33, 0.0 }
 0x4b2   :  { %v1142_v37 = vpack.c.bf16 %v1130_v34, %v1129_v6 }
 0x4b3   :  { %v1141_v39 = vpack.c.bf16 %v1128_v36, %v1127_v35  ;;  %v3622_v41 = vpop.f32.mrb[40].mxu0  ;;  %3695 = vmatpush3.bf16.msra.mxu1 %v3984_v60 }
 0x4b4   :  { %v1101_v43 = vadd.f32 %v3622_v41, %v3060_v2  ;;  %v1092_v44 = vpop.f32.mrb[41].mxu0  ;;  %3696 = vmatprep.subr.bf16.mxu1 %v3985_v61 }
 0x4b5   :  { %v1093_v45 = vadd.f32 %v3060_v2, %v1092_v44  ;;  %v3623_v54 = vpop.f32.mrb[42].mxu0  ;;  %3648 = vmatprep.mubr.bf16.mxu1 %v1141_v39 }
 0x4b6   :  { %v1104_v10 = vadd.f32 %v3623_v54, %v3060_v2  ;;  %v1095_v46 = vpop.f32.mrb[43].mxu0  ;;  %3649 = vmatmul.mubr.bf16.gmra.mrb[36].mxu1 %v1142_v37  ;;  %v1133_v48 = vmax.f32 %v1101_v43, 0.0 }
 0x4b7   :  { %v1096_v47 = vadd.f32 %v3060_v2, %v1095_v46  ;;  %v1131_v38 = vmax.f32 %v1093_v45, 0.0  ;;  %3697 = vmatpush3.bf16.msra.mxu1 %v3985_v61 }
 0x4b8   :  { %v1134_v32 = vmax.f32 %v1104_v10, 0.0  ;;  %3698 = vmatprep.subr.bf16.mxu1 %v3986_v49 }
 0x4b9   :  { %v1132_v50 = vmax.f32 %v1096_v47, 0.0 }
 0x4ba   :  { %v1144_v12 = vpack.c.bf16 %v1134_v32, %v1133_v48 }
 0x4bb   :  { %v1143_v58 = vpack.c.bf16 %v1132_v50, %v1131_v38  ;;  %v3626_v15 = vpop.f32.mrb[44].mxu0  ;;  %3699 = vmatpush3.bf16.msra.mxu1 %v3986_v49 }
 0x4bc   :  { %v1117_v16 = vadd.f32 %v3626_v15, %v3060_v2  ;;  %v1108_v17 = vpop.f32.mrb[45].mxu0  ;;  %3700 = vmatprep.subr.bf16.mxu1 %v3987_v63 }
 0x4bd   :  { %v1109_v18 = vadd.f32 %v3060_v2, %v1108_v17  ;;  %v3627_v19 = vpop.f32.mrb[46].mxu0  ;;  %3652 = vmatprep.mubr.bf16.mxu1 %v1143_v58 }
 0x4be   :  { %v1120_v20 = vadd.f32 %v3627_v19, %v3060_v2  ;;  %v1111_v21 = vpop.f32.mrb[47].mxu0  ;;  %3653 = vmatmul.mubr.bf16.gmra.mrb[40].mxu1 %v1144_v12  ;;  %v1137_v3 = vmax.f32 %v1117_v16, 0.0 }
 0x4bf   :  { %v1112_v0 = vadd.f32 %v3060_v2, %v1111_v21  ;;  %v1135_v55 = vmax.f32 %v1109_v18, 0.0  ;;  %3701 = vmatpush3.bf16.msra.mxu1 %v3987_v63  ;;  %v4564_v2 = vld [vmem:[%s5150_s7 + $0x1] ss:$0 sm:$0xff] }
 0x4c0   :  { %v1138_v53 = vmax.f32 %v1120_v20, 0.0  ;;  %3702 = vmatprep.subr.bf16.mxu1 %v3988_v52 }
 0x4c1   :  { %v1136_v56 = vmax.f32 %v1112_v0, 0.0 }
 0x4c2   :  { %v1146_v57 = vpack.c.bf16 %v1138_v53, %v1137_v3 }
 0x4c3   :  { %v1145_v59 = vpack.c.bf16 %v1136_v56, %v1135_v55  ;;  %3703 = vmatpush3.bf16.msra.mxu1 %v3988_v52 }
 0x4c5   :  { %3656 = vmatprep.mubr.bf16.mxu1 %v1145_v59 }
 0x4c6   :  { %3657 = vmatmul.mubr.bf16.gmra.mrb[44].mxu1 %v1146_v57 }
 0x581   :  { %v3646_v4 = vpop.f32.mrb[32].mxu1 }
 0x582   :  { %v1263_v7 = vadd.f32 %v3646_v4, %v4564_v2  ;;  %v1254_v9 = vpop.f32.mrb[33].mxu1 }
 0x583   :  { %v1255_v40 = vadd.f32 %v4564_v2, %v1254_v9  ;;  %v3647_v42 = vpop.f32.mrb[34].mxu1 }
 0x584   :  { %v1319_v13 = vmax.f32 %v1263_v7, 0.0  ;;  %v1266_v14 = vadd.f32 %v3647_v42, %v4564_v2  ;;  %v1257_v22 = vpop.f32.mrb[35].mxu1 }
 0x585   :  { %v1317_v24 = vmax.f32 %v1255_v40, 0.0  ;;  %v1258_v8 = vadd.f32 %v4564_v2, %v1257_v22 }
 0x586   :  { %v1343_v25 = vmul.f32 %v4570_v11, %v1319_v13  ;;  %v1320_v26 = vmax.f32 %v1266_v14, 0.0 }
 0x587   :  { %v1341_v27 = vmul.f32 %v4570_v11, %v1317_v24  ;;  %v1318_v5 = vmax.f32 %v1258_v8, 0.0 }
 0x588   :  { %v1367_v28 = vadd.f32 %v4577_v23, %v1343_v25  ;;  %v1344_v29 = vmul.f32 %v4570_v11, %v1320_v26 }
 0x589   :  { %v1365_v30 = vadd.f32 %v4577_v23, %v1341_v27  ;;  %v1342_v31 = vmul.f32 %v4570_v11, %v1318_v5  ;;  %v3650_v1 = vpop.f32.mrb[36].mxu1 }
 0x58a   :  { %v1368_v33 = vadd.f32 %v4577_v23, %v1344_v29  ;;  %v1279_v6 = vadd.f32 %v3650_v1, %v4564_v2  ;;  %v1270_v34 = vpop.f32.mrb[37].mxu1  ;;  %v1383_v39 = vmax.f32 %v1367_v28, 0.0 }
 0x58b   :  { %v1366_v35 = vadd.f32 %v4577_v23, %v1342_v31  ;;  %v1271_v36 = vadd.f32 %v4564_v2, %v1270_v34  ;;  %v3651_v37 = vpop.f32.mrb[38].mxu1  ;;  %v1381_v54 = vmax.f32 %v1365_v30, 0.0 }
 0x58c   :  { %v1384_v41 = vmax.f32 %v1368_v33, 0.0  ;;  %v1323_v43 = vmax.f32 %v1279_v6, 0.0  ;;  %v1282_v44 = vadd.f32 %v3651_v37, %v4564_v2  ;;  %v1273_v45 = vpop.f32.mrb[39].mxu1 }
 0x58d   :  { %v1382_v10 = vmax.f32 %v1366_v35, 0.0  ;;  %v1321_v46 = vmax.f32 %v1271_v36, 0.0  ;;  %v1274_v47 = vadd.f32 %v4564_v2, %v1273_v45 }
 0x58e   :  { %v1347_v48 = vmul.f32 %v4570_v11, %v1323_v43  ;;  %v1324_v32 = vmax.f32 %v1282_v44, 0.0  ;;  %v4593_v38 = vpack.c.bf16 %v1384_v41, %v1383_v39 }
 0x58f   :  { %v1345_v50 = vmul.f32 %v4570_v11, %v1321_v46  ;;  %v1322_v12 = vmax.f32 %v1274_v47, 0.0  ;;  %v4596_v58 = vpack.c.bf16 %v1382_v10, %v1381_v54 }
 0x590   :  { %v1371_v15 = vadd.f32 %v4577_v23, %v1347_v48  ;;  %v1348_v16 = vmul.f32 %v4570_v11, %v1324_v32 }
 0x591   :  { %v1369_v17 = vadd.f32 %v4577_v23, %v1345_v50  ;;  %v1346_v18 = vmul.f32 %v4570_v11, %v1322_v12  ;;  %v3654_v19 = vpop.f32.mrb[40].mxu1  ;;  %3660 = vmatprep.subr.bf16.mxu0 %v4596_v58 }
 0x592   :  { %v1372_v20 = vadd.f32 %v4577_v23, %v1348_v16  ;;  %v1295_v21 = vadd.f32 %v3654_v19, %v4564_v2  ;;  %v1286_v0 = vpop.f32.mrb[41].mxu1  ;;  %3661 = vmatpush3.bf16.msra.mxu0 %v4596_v58  ;;  %v1387_v56 = vmax.f32 %v1371_v15, 0.0 }
 0x593   :  { %v1370_v3 = vadd.f32 %v4577_v23, %v1346_v18  ;;  %v1287_v53 = vadd.f32 %v4564_v2, %v1286_v0  ;;  %v3655_v55 = vpop.f32.mrb[42].mxu1  ;;  %3662 = vmatprep.subr.bf16.mxu0 %v4593_v38  ;;  %v1385_v61 = vmax.f32 %v1369_v17, 0.0  ;;  %v4683_v0 = vld [vmem:[%s5144_s1 + $0x28] sm:$0xff]  }
 0x594   :  { %v1388_v57 = vmax.f32 %v1372_v20, 0.0  ;;  %v1327_v59 = vmax.f32 %v1295_v21, 0.0  ;;  %v1298_v51 = vadd.f32 %v3655_v55, %v4564_v2  ;;  %v1289_v60 = vpop.f32.mrb[43].mxu1  ;;  %v4671_v20 = vld [vmem:[%s5144_s1 + $0x18] sm:$0xff]   ;;  %v4677_v21 = vld [vmem:[%s5144_s1 + $0x20] sm:$0xff]   ;;  %v3989_v55 = vld [vmem:[%s5147_s4 + $0xb0] sm:$0xff]  }
 0x595   :  { %v1386_v49 = vmax.f32 %v1370_v3, 0.0  ;;  %v1325_v63 = vmax.f32 %v1287_v53, 0.0  ;;  %v1290_v52 = vadd.f32 %v4564_v2, %v1289_v60  ;;  %v4689_v3 = vld [vmem:[%s5144_s1 + $0x30] sm:$0xff]   ;;  %v4695_v53 = vld [vmem:[%s5144_s1 + $0x38] sm:$0xff]   ;;  %3704 = vmatprep.subr.bf16.mxu1 %v3989_v55 }
 0x596   :  { %v1351_v4 = vmul.f32 %v4570_v11, %v1327_v59  ;;  %v1328_v7 = vmax.f32 %v1298_v51, 0.0  ;;  %3663 = vmatpush3.bf16.msra.mxu0 %v4593_v38  ;;  %v4613_v9 = vpack.c.bf16 %v1388_v57, %v1387_v56  ;;  %3705 = vmatpush3.bf16.msra.mxu1 %v3989_v55  ;;  %v3990_v56 = vld [vmem:[%s5147_s4 + $0xb8] sm:$0xff]   ;;  %v3991_v57 = vld [vmem:[%s5149_s6 + $0x80] sm:$0xff]   ;;  %v3992_v59 = vld [vmem:[%s5149_s6 + $0x88] sm:$0xff]  }
 0x597   :  { %v1349_v40 = vmul.f32 %v4570_v11, %v1325_v63  ;;  %v1326_v42 = vmax.f32 %v1290_v52, 0.0  ;;  %v4616_v13 = vpack.c.bf16 %v1386_v49, %v1385_v61  ;;  %3706 = vmatprep.subr.bf16.mxu1 %v3990_v56  ;;  %v3993_v51 = vld [vmem:[%s5149_s6 + $0x90] sm:$0xff]   ;;  %v3994_v60 = vld [vmem:[%s5149_s6 + $0x98] sm:$0xff]   ;;  %v3995_v61 = vld [vmem:[%s5149_s6 + $0xa0] sm:$0xff]   ;;  %v1506_v63 = vunpack.c.l.bf16 %v4593_v38 }
 0x598   :  { %v1375_v14 = vadd.f32 %v4577_v23, %v1351_v4  ;;  %v1352_v22 = vmul.f32 %v4570_v11, %v1328_v7  ;;  %v3996_v49 = vld [vmem:[%s5149_s6 + $0xa8] sm:$0xff]   ;;  %v4723_v52 = vstv %s1503_s28  ;;  %v1504_v4 = vunpack.c.l.bf16 %v4596_v58 }
 0x599   :  { %v1373_v24 = vadd.f32 %v4577_v23, %v1349_v40  ;;  %v1350_v8 = vmul.f32 %v4570_v11, %v1326_v42  ;;  %v3658_v25 = vpop.f32.mrb[44].mxu1  ;;  %3664 = vmatprep.subr.bf16.mxu0 %v4616_v13  ;;  %v1507_v7 = vunpack.c.h.bf16 %v4593_v38  ;;  %v1505_v40 = vunpack.c.h.bf16 %v4596_v58 }
 0x59a   :  { %v1376_v26 = vadd.f32 %v4577_v23, %v1352_v22  ;;  %v1311_v27 = vadd.f32 %v3658_v25, %v4564_v2  ;;  %v1302_v5 = vpop.f32.mrb[45].mxu1  ;;  %3665 = vmatpush3.bf16.msra.mxu0 %v4616_v13  ;;  %v1391_v31 = vmax.f32 %v1375_v14, 0.0  ;;  %3707 = vmatpush3.bf16.msra.mxu1 %v3990_v56  ;;  %v1523_v42 = vmul.f32 %v4723_v52, %v1506_v63 }
 0x59b   :  { %v1374_v28 = vadd.f32 %v4577_v23, %v1350_v8  ;;  %v1303_v29 = vadd.f32 %v4564_v2, %v1302_v5  ;;  %v3659_v30 = vpop.f32.mrb[46].mxu1  ;;  %3666 = vmatprep.subr.bf16.mxu0 %v4613_v9  ;;  %v1389_v35 = vmax.f32 %v1373_v24, 0.0  ;;  %v1521_v22 = vmul.f32 %v4723_v52, %v1504_v4 }
 0x59c   :  { %v1392_v1 = vmax.f32 %v1376_v26, 0.0  ;;  %v1331_v33 = vmax.f32 %v1311_v27, 0.0  ;;  %v1314_v6 = vadd.f32 %v3659_v30, %v4564_v2  ;;  %v1305_v34 = vpop.f32.mrb[47].mxu1  ;;  %v1524_v25 = vmul.f32 %v4723_v52, %v1507_v7 }
 0x59d   :  { %v1390_v36 = vmax.f32 %v1374_v28, 0.0  ;;  %v1329_v37 = vmax.f32 %v1303_v29, 0.0  ;;  %v1306_v39 = vadd.f32 %v4564_v2, %v1305_v34  ;;  %v1522_v5 = vmul.f32 %v4723_v52, %v1505_v40 }
 0x59e   :  { %v1355_v41 = vmul.f32 %v4570_v11, %v1331_v33  ;;  %v1332_v43 = vmax.f32 %v1314_v6, 0.0  ;;  %3667 = vmatpush3.bf16.msra.mxu0 %v4613_v9  ;;  %v4633_v44 = vpack.c.bf16 %v1392_v1, %v1391_v31  ;;  %v1510_v30 = vunpack.c.l.bf16 %v4613_v9 }
 0x59f   :  { %v1353_v45 = vmul.f32 %v4570_v11, %v1329_v37  ;;  %v1330_v54 = vmax.f32 %v1306_v39, 0.0  ;;  %v4636_v10 = vpack.c.bf16 %v1390_v36, %v1389_v35  ;;  %v1508_v58 = vunpack.c.l.bf16 %v4616_v13 }
 0x5a0   :  { %v1379_v46 = vadd.f32 %v4577_v23, %v1355_v41  ;;  %v1356_v47 = vmul.f32 %v4570_v11, %v1332_v43  ;;  %v1511_v1 = vunpack.c.h.bf16 %v4613_v9  ;;  %v1509_v6 = vunpack.c.h.bf16 %v4616_v13 }
 0x5a1   :  { %v1377_v48 = vadd.f32 %v4577_v23, %v1353_v45  ;;  %v1354_v2 = vmul.f32 %v4570_v11, %v1330_v54  ;;  %3668 = vmatprep.subr.bf16.mxu0 %v4636_v10  ;;  %v4659_v11 = vld [vmem:[%s5144_s1 + $0x8] sm:$0xff]   ;;  %v1527_v34 = vmul.f32 %v4723_v52, %v1510_v30  ;;  %v1525_v36 = vmul.f32 %v4723_v52, %v1508_v58  ;;  %v3997_v58 = vld [vmem:[%s5149_s6 + $0xb0] sm:$0xff]  }
 0x5a2   :  { %v1380_v32 = vadd.f32 %v4577_v23, %v1356_v47  ;;  %3669 = vmatpush3.bf16.msra.mxu0 %v4636_v10  ;;  %v1395_v12 = vmax.f32 %v1379_v46, 0.0  ;;  %v1528_v41 = vmul.f32 %v4723_v52, %v1511_v1  ;;  %v1526_v54 = vmul.f32 %v4723_v52, %v1509_v6 }
 0x5a3   :  { %v1378_v50 = vadd.f32 %v4577_v23, %v1354_v2  ;;  %3670 = vmatprep.subr.bf16.mxu0 %v4633_v44  ;;  %v1393_v16 = vmax.f32 %v1377_v48, 0.0  ;;  %v4665_v23 = vld [vmem:[%s5144_s1 + $0x10] sm:$0xff]   ;;  %v1514_v47 = vunpack.c.l.bf16 %v4633_v44  ;;  %v1512_v48 = vunpack.c.l.bf16 %v4636_v10  ;;  %s3156_s1 = sld [smem:[#allocation2 + $0x3]] }
 0x5a4   :  { %v1396_v15 = vmax.f32 %v1380_v32, 0.0  ;;  %v1515_v32 = vunpack.c.h.bf16 %v4633_v44 }
 0x5a5   :  { %v1394_v17 = vmax.f32 %v1378_v50, 0.0 }
 0x5a6   :  { %3671 = vmatpush3.bf16.msra.mxu0 %v4633_v44  ;;  %v4648_v18 = vpack.c.bf16 %v1396_v15, %v1395_v12  ;;  %v1513_v12 = vunpack.c.h.bf16 %v4636_v10  ;;  %v1531_v15 = vmul.f32 %v4723_v52, %v1514_v47 }
 0x5a7   :  { %v4650_v19 = vpack.c.bf16 %v1394_v17, %v1393_v16  ;;  %v1529_v17 = vmul.f32 %v4723_v52, %v1512_v48 }
 0x5a8   :  { %v1519_v7 = vunpack.c.h.bf16 %v4648_v18 }
 0x5a9   :  { %3672 = vmatprep.subr.bf16.mxu0 %v4650_v19  ;;  %v1516_v63 = vunpack.c.l.bf16 %v4650_v19  ;;  %s2111_s19 = sadd.f32 1.0, %s3156_s1 }
 0x5aa   :  { %3673 = vmatpush3.bf16.msra.mxu0 %v4650_v19 }
 0x5ab   :  { %3674 = vmatprep.subr.bf16.mxu0 %v4648_v18 }
 0x5ae   :  { %3675 = vmatpush3.bf16.msra.mxu0 %v4648_v18 }
 0x5af   :  { %3724 = vmatprep.subr.bf16.mxu0 %v3991_v57 }
 0x5b1   :  { %3677 = vmatmul.mubr.bf16.vlgmr.msra.gmra.mrb[48].mxu0 %v4659_v11 }
 0x5b2   :  { %3680 = vmatprep.mubr.bf16.mxu0 %v4665_v23  ;;  %3725 = vmatpush3.bf16.msra.mxu0 %v3991_v57  ;;  %v1532_v57 = vmul.f32 %v4723_v52, %v1515_v32 }
 0x5b3   :  { %3726 = vmatprep.subr.bf16.mxu0 %v3992_v59 }
 0x5b6   :  { %3727 = vmatpush3.bf16.msra.mxu0 %v3992_v59 }
 0x5b7   :  { %3728 = vmatprep.subr.bf16.mxu0 %v3993_v51 }
 0x5b9   :  { %3681 = vmatmul.mubr.bf16.gmra.mrb[52].mxu0 %v4671_v20 }
 0x5ba   :  { %3684 = vmatprep.mubr.bf16.mxu0 %v4677_v21  ;;  %3729 = vmatpush3.bf16.msra.mxu0 %v3993_v51 }
 0x5bb   :  { %3730 = vmatprep.subr.bf16.mxu0 %v3994_v60 }
 0x5be   :  { %3731 = vmatpush3.bf16.msra.mxu0 %v3994_v60  ;;  %v1530_v60 = vmul.f32 %v4723_v52, %v1513_v12 }
 0x5bf   :  { %3732 = vmatprep.subr.bf16.mxu0 %v3995_v61 }
 0x5c1   :  { %3685 = vmatmul.mubr.bf16.gmra.mrb[56].mxu0 %v4683_v0 }
 0x5c2   :  { %3688 = vmatprep.mubr.bf16.mxu0 %v4689_v3  ;;  %3733 = vmatpush3.bf16.msra.mxu0 %v3995_v61 }
 0x5c3   :  { %3734 = vmatprep.subr.bf16.mxu0 %v3996_v49 }
 0x5c6   :  { %3735 = vmatpush3.bf16.msra.mxu0 %v3996_v49  ;;  %v1518_v49 = vunpack.c.l.bf16 %v4648_v18 }
 0x5c7   :  { %3736 = vmatprep.subr.bf16.mxu0 %v3997_v58 }
 0x5c9   :  { %3689 = vmatmul.mubr.bf16.gmra.mrb[60].mxu0 %v4695_v53 }
 0x5ca   :  { %3737 = vmatpush3.bf16.msra.mxu0 %v3997_v58 }
 0x684   :  { %v3678_v14 = vpop.f32.mrb[48].mxu0 }
 0x685   :  { %v1539_v24 = vadd.f32 %v3678_v14, %v1523_v42  ;;  %v1440_v8 = vpop.f32.mrb[49].mxu0  ;;  %v1517_v42 = vunpack.c.h.bf16 %v4650_v19  ;;  %v1535_v14 = vmul.f32 %v4723_v52, %v1518_v49 }
 0x686   :  { %v1537_v26 = vadd.f32 %v1521_v22, %v1440_v8  ;;  %v3679_v27 = vpop.f32.mrb[50].mxu0 }
 0x687   :  { %v1540_v28 = vadd.f32 %v3679_v27, %v1524_v25  ;;  %v1443_v29 = vpop.f32.mrb[51].mxu0 }
 0x688   :  { %v1538_v38 = vadd.f32 %v1522_v5, %v1443_v29 }
 0x689   :  { %v1554_v31 = vpack.c.bf16 %v1540_v28, %v1539_v24  ;;  %v1533_v24 = vmul.f32 %v4723_v52, %v1516_v63  ;;  %v1534_v28 = vmul.f32 %v4723_v52, %v1517_v42 }
 0x68a   :  { %v1553_v33 = vpack.c.bf16 %v1538_v38, %v1537_v26  ;;  %v1536_v26 = vmul.f32 %v4723_v52, %v1519_v7  ;;  %v3117_v52 = vld [vmem:[%s5148_s5 + $0x2] ss:$0 sm:$0xff] }
 0x68c   :  { %v3682_v35 = vpop.f32.mrb[52].mxu0  ;;  %3708 = vmatprep.mubr.bf16.mxu1 %v1553_v33 }
 0x68d   :  { %v1543_v37 = vadd.f32 %v3682_v35, %v1527_v34  ;;  %v1456_v39 = vpop.f32.mrb[53].mxu0  ;;  %3709 = vmatmul.mubr.bf16.vlgmr.msra.gmra.mrb[48].mxu1 %v1554_v31  ;;  %v3998_v31 = vld [vmem:[%s5149_s6 + $0xb8] sm:$0xff]  }
 0x68e   :  { %v1541_v43 = vadd.f32 %v1525_v36, %v1456_v39  ;;  %v3683_v45 = vpop.f32.mrb[54].mxu0  ;;  %3738 = vmatprep.subr.bf16.mxu0 %v3998_v31 }
 0x68f   :  { %v1544_v46 = vadd.f32 %v3683_v45, %v1528_v41  ;;  %v1459_v9 = vpop.f32.mrb[55].mxu0  ;;  %3739 = vmatpush3.bf16.msra.mxu0 %v3998_v31 }
 0x690   :  { %v1542_v13 = vadd.f32 %v1526_v54, %v1459_v9 }
 0x691   :  { %v1556_v2 = vpack.c.bf16 %v1544_v46, %v1543_v37 }
 0x692   :  { %v1555_v50 = vpack.c.bf16 %v1542_v13, %v1541_v43 }
 0x694   :  { %v3686_v16 = vpop.f32.mrb[56].mxu0  ;;  %3712 = vmatprep.mubr.bf16.mxu1 %v1555_v50 }
 0x695   :  { %v1547_v55 = vadd.f32 %v3686_v16, %v1531_v15  ;;  %v1472_v56 = vpop.f32.mrb[57].mxu0  ;;  %3713 = vmatmul.mubr.bf16.gmra.mrb[52].mxu1 %v1556_v2 }
 0x696   :  { %v1545_v59 = vadd.f32 %v1529_v17, %v1472_v56  ;;  %v3687_v51 = vpop.f32.mrb[58].mxu0 }
 0x697   :  { %v1548_v61 = vadd.f32 %v3687_v51, %v1532_v57  ;;  %v1475_v44 = vpop.f32.mrb[59].mxu0 }
 0x698   :  { %v1546_v10 = vadd.f32 %v1530_v60, %v1475_v44 }
 0x699   :  { %v1558_v4 = vpack.c.bf16 %v1548_v61, %v1547_v55 }
 0x69a   :  { %v1557_v40 = vpack.c.bf16 %v1546_v10, %v1545_v59 }
 0x69c   :  { %v3690_v22 = vpop.f32.mrb[60].mxu0  ;;  %3716 = vmatprep.mubr.bf16.mxu1 %v1557_v40 }
 0x69d   :  { %v1551_v8 = vadd.f32 %v3690_v22, %v1535_v14  ;;  %v1488_v25 = vpop.f32.mrb[61].mxu0  ;;  %3717 = vmatmul.mubr.bf16.gmra.mrb[56].mxu1 %v1558_v4 }
 0x69e   :  { %v1549_v27 = vadd.f32 %v1533_v24, %v1488_v25  ;;  %v3691_v5 = vpop.f32.mrb[62].mxu0 }
 0x69f   :  { %v1552_v29 = vadd.f32 %v3691_v5, %v1536_v26  ;;  %v1491_v18 = vpop.f32.mrb[63].mxu0 }
 0x6a0   :  { %v1550_v30 = vadd.f32 %v1534_v28, %v1491_v18 }
 0x6a1   :  { %v1560_v38 = vpack.c.bf16 %v1552_v29, %v1551_v8 }
 0x6a2   :  { %v1559_v19 = vpack.c.bf16 %v1550_v30, %v1549_v27 }
 0x6a4   :  { %3720 = vmatprep.mubr.bf16.mxu1 %v1559_v19 }
 0x6a5   :  { %3721 = vmatmul.mubr.bf16.gmra.mrb[60].mxu1 %v1560_v38 }
 0x6a6   :  { %3772 = vmatprep.mubr.bf16.mxu1 %v4531_v62 }
 0x760   :  { %v3710_v1 = vpop.f32.mrb[48].mxu1 }
 0x761   :  { %v1677_v33 = vadd.f32 %v3710_v1, %v3117_v52  ;;  %v1668_v6 = vpop.f32.mrb[49].mxu1  ;;  %v3999_v1 = vld [vmem:[%s5147_s4 + $0xc0] sm:$0xff]  }
 0x762   :  { %v1669_v62 = vadd.f32 %v3117_v52, %v1668_v6  ;;  %v3711_v34 = vpop.f32.mrb[50].mxu1  ;;  %3788 = vmatprep.subr.bf16.mxu0 %v3999_v1  ;;  %v4002_v6 = vld [vmem:[%s5147_s4 + $0xd8] sm:$0xff]  }
 0x763   :  { %v1680_v35 = vadd.f32 %v3711_v34, %v3117_v52  ;;  %v1671_v36 = vpop.f32.mrb[51].mxu1  ;;  %v1733_v39 = vmax.f32 %v1677_v33, 0.0  ;;  %v4000_v33 = vld [vmem:[%s5147_s4 + $0xc8] sm:$0xff]  }
 0x764   :  { %v1672_v37 = vadd.f32 %v3117_v52, %v1671_v36  ;;  %v1731_v43 = vmax.f32 %v1669_v62, 0.0  ;;  %v4003_v62 = vld [vmem:[%s5147_s4 + $0xe0] sm:$0xff]   ;;  %v4004_v34 = vld [vmem:[%s5147_s4 + $0xe8] sm:$0xff]  }
 0x765   :  { %v1734_v41 = vmax.f32 %v1680_v35, 0.0  ;;  %v4787_v35 = vld [vmem:[%s5150_s7 + $0x2] ss:$0 sm:$0xff] }
 0x766   :  { %v1732_v45 = vmax.f32 %v1672_v37, 0.0 }
 0x767   :  { %v1748_v54 = vpack.c.bf16 %v1734_v41, %v1733_v39  ;;  %v4793_v41 = vld [vmem:[%s5151_s8 + $0x2] ss:$0 sm:$0xff] }
 0x768   :  { %v1747_v46 = vpack.c.bf16 %v1732_v45, %v1731_v43  ;;  %v3714_v9 = vpop.f32.mrb[52].mxu1 }
 0x769   :  { %v1693_v47 = vadd.f32 %v3714_v9, %v3117_v52  ;;  %v1684_v13 = vpop.f32.mrb[53].mxu1 }
 0x76a   :  { %v1685_v48 = vadd.f32 %v3117_v52, %v1684_v13  ;;  %v3715_v2 = vpop.f32.mrb[54].mxu1  ;;  %3740 = vmatprep.mubr.bf16.mxu0 %v1747_v46 }
 0x76b   :  { %v1696_v32 = vadd.f32 %v3715_v2, %v3117_v52  ;;  %v1687_v50 = vpop.f32.mrb[55].mxu1  ;;  %3741 = vmatmul.mubr.bf16.vlgmr.msra.gmra.mrb[64].mxu0 %v1748_v54  ;;  %v1737_v15 = vmax.f32 %v1693_v47, 0.0  ;;  %v4800_v47 = vld [vmem:[%s5152_s9 + $0x2] ss:$0 sm:$0xff] }
 0x76c   :  { %v1688_v12 = vadd.f32 %v3117_v52, %v1687_v50  ;;  %v1735_v17 = vmax.f32 %v1685_v48, 0.0  ;;  %3789 = vmatpush3.bf16.msra.mxu0 %v3999_v1 }
 0x76d   :  { %v1738_v16 = vmax.f32 %v1696_v32, 0.0  ;;  %3790 = vmatprep.subr.bf16.mxu0 %v4000_v33 }
 0x76e   :  { %v1736_v55 = vmax.f32 %v1688_v12, 0.0 }
 0x76f   :  { %v1750_v56 = vpack.c.bf16 %v1738_v16, %v1737_v15 }
 0x770   :  { %v1749_v57 = vpack.c.bf16 %v1736_v55, %v1735_v17  ;;  %v3718_v59 = vpop.f32.mrb[56].mxu1  ;;  %3791 = vmatpush3.bf16.msra.mxu0 %v4000_v33 }
 0x771   :  { %v1709_v51 = vadd.f32 %v3718_v59, %v3117_v52  ;;  %v1700_v60 = vpop.f32.mrb[57].mxu1 }
 0x772   :  { %v1701_v61 = vadd.f32 %v3117_v52, %v1700_v60  ;;  %v3719_v44 = vpop.f32.mrb[58].mxu1  ;;  %3744 = vmatprep.mubr.bf16.mxu0 %v1749_v57 }
 0x773   :  { %v1712_v49 = vadd.f32 %v3719_v44, %v3117_v52  ;;  %v1703_v10 = vpop.f32.mrb[59].mxu1  ;;  %3745 = vmatmul.mubr.bf16.gmra.mrb[68].mxu0 %v1750_v56  ;;  %v1741_v4 = vmax.f32 %v1709_v51, 0.0 }
 0x774   :  { %v1704_v63 = vadd.f32 %v3117_v52, %v1703_v10  ;;  %v1739_v40 = vmax.f32 %v1701_v61, 0.0 }
 0x775   :  { %v1742_v7 = vmax.f32 %v1712_v49, 0.0 }
 0x776   :  { %v1740_v42 = vmax.f32 %v1704_v63, 0.0 }
 0x777   :  { %v1752_v14 = vpack.c.bf16 %v1742_v7, %v1741_v4 }
 0x778   :  { %v1751_v22 = vpack.c.bf16 %v1740_v42, %v1739_v40  ;;  %v3722_v24 = vpop.f32.mrb[60].mxu1 }
 0x779   :  { %v1725_v8 = vadd.f32 %v3722_v24, %v3117_v52  ;;  %v1716_v25 = vpop.f32.mrb[61].mxu1 }
 0x77a   :  { %v1717_v26 = vadd.f32 %v3117_v52, %v1716_v25  ;;  %v3723_v27 = vpop.f32.mrb[62].mxu1  ;;  %3748 = vmatprep.mubr.bf16.mxu0 %v1751_v22 }
 0x77b   :  { %v1728_v5 = vadd.f32 %v3723_v27, %v3117_v52  ;;  %v1719_v28 = vpop.f32.mrb[63].mxu1  ;;  %3749 = vmatmul.mubr.bf16.gmra.mrb[72].mxu0 %v1752_v14  ;;  %v1745_v18 = vmax.f32 %v1725_v8, 0.0 }
 0x77c   :  { %v1720_v29 = vadd.f32 %v3117_v52, %v1719_v28  ;;  %v1743_v38 = vmax.f32 %v1717_v26, 0.0  ;;  %v4001_v52 = vld [vmem:[%s5147_s4 + $0xd0] sm:$0xff]  }
 0x77d   :  { %v1746_v30 = vmax.f32 %v1728_v5, 0.0  ;;  %3792 = vmatprep.subr.bf16.mxu0 %v4001_v52 }
 0x77e   :  { %v1744_v19 = vmax.f32 %v1720_v29, 0.0  ;;  %3793 = vmatpush3.bf16.msra.mxu0 %v4001_v52 }
 0x77f   :  { %v1754_v58 = vpack.c.bf16 %v1746_v30, %v1745_v18  ;;  %3794 = vmatprep.subr.bf16.mxu0 %v4002_v6 }
 0x780   :  { %v1753_v31 = vpack.c.bf16 %v1744_v19, %v1743_v38 }
 0x782   :  { %3752 = vmatprep.mubr.bf16.mxu0 %v1753_v31  ;;  %3795 = vmatpush3.bf16.msra.mxu0 %v4002_v6 }
 0x783   :  { %3753 = vmatmul.mubr.bf16.gmra.mrb[76].mxu0 %v1754_v58  ;;  %3796 = vmatprep.subr.bf16.mxu0 %v4003_v62 }
 0x786   :  { %3797 = vmatpush3.bf16.msra.mxu0 %v4003_v62 }
 0x787   :  { %3798 = vmatprep.subr.bf16.mxu0 %v4004_v34 }
 0x78a   :  { %3799 = vmatpush3.bf16.msra.mxu0 %v4004_v34 }
 0x83e   :  { %v3742_v36 = vpop.f32.mrb[64].mxu0 }
 0x83f   :  { %v1871_v37 = vadd.f32 %v3742_v36, %v4787_v35  ;;  %v1862_v39 = vpop.f32.mrb[65].mxu0 }
 0x840   :  { %v1863_v43 = vadd.f32 %v4787_v35, %v1862_v39  ;;  %v3743_v45 = vpop.f32.mrb[66].mxu0 }
 0x841   :  { %v1927_v54 = vmax.f32 %v1871_v37, 0.0  ;;  %v1874_v46 = vadd.f32 %v3743_v45, %v4787_v35  ;;  %v1865_v9 = vpop.f32.mrb[67].mxu0 }
 0x842   :  { %v1925_v13 = vmax.f32 %v1863_v43, 0.0  ;;  %v1866_v48 = vadd.f32 %v4787_v35, %v1865_v9 }
 0x843   :  { %v1951_v2 = vmul.f32 %v4793_v41, %v1927_v54  ;;  %v1928_v32 = vmax.f32 %v1874_v46, 0.0 }
 0x844   :  { %v1949_v50 = vmul.f32 %v4793_v41, %v1925_v13  ;;  %v1926_v12 = vmax.f32 %v1866_v48, 0.0 }
 0x845   :  { %v1975_v15 = vadd.f32 %v4800_v47, %v1951_v2  ;;  %v1952_v16 = vmul.f32 %v4793_v41, %v1928_v32 }
 0x846   :  { %v1973_v17 = vadd.f32 %v4800_v47, %v1949_v50  ;;  %v1950_v55 = vmul.f32 %v4793_v41, %v1926_v12  ;;  %v3746_v56 = vpop.f32.mrb[68].mxu0 }
 0x847   :  { %v1976_v57 = vadd.f32 %v4800_v47, %v1952_v16  ;;  %v1887_v59 = vadd.f32 %v3746_v56, %v4787_v35  ;;  %v1878_v51 = vpop.f32.mrb[69].mxu0  ;;  %v1991_v49 = vmax.f32 %v1975_v15, 0.0 }
 0x848   :  { %v1974_v60 = vadd.f32 %v4800_v47, %v1950_v55  ;;  %v1879_v61 = vadd.f32 %v4787_v35, %v1878_v51  ;;  %v3747_v44 = vpop.f32.mrb[70].mxu0  ;;  %v1989_v40 = vmax.f32 %v1973_v17, 0.0 }
 0x849   :  { %v1992_v10 = vmax.f32 %v1976_v57, 0.0  ;;  %v1931_v63 = vmax.f32 %v1887_v59, 0.0  ;;  %v1890_v4 = vadd.f32 %v3747_v44, %v4787_v35  ;;  %v1881_v7 = vpop.f32.mrb[71].mxu0 }
 0x84a   :  { %v1990_v42 = vmax.f32 %v1974_v60, 0.0  ;;  %v1929_v14 = vmax.f32 %v1879_v61, 0.0  ;;  %v1882_v22 = vadd.f32 %v4787_v35, %v1881_v7 }
 0x84b   :  { %v1955_v24 = vmul.f32 %v4793_v41, %v1931_v63  ;;  %v1932_v8 = vmax.f32 %v1890_v4, 0.0  ;;  %v4816_v25 = vpack.c.bf16 %v1992_v10, %v1991_v49 }
 0x84c   :  { %v1953_v26 = vmul.f32 %v4793_v41, %v1929_v14  ;;  %v1930_v27 = vmax.f32 %v1882_v22, 0.0  ;;  %v4819_v5 = vpack.c.bf16 %v1990_v42, %v1989_v40 }
 0x84d   :  { %v1979_v28 = vadd.f32 %v4800_v47, %v1955_v24  ;;  %v1956_v29 = vmul.f32 %v4793_v41, %v1932_v8 }
 0x84e   :  { %v1977_v18 = vadd.f32 %v4800_v47, %v1953_v26  ;;  %v1954_v30 = vmul.f32 %v4793_v41, %v1930_v27  ;;  %v3750_v38 = vpop.f32.mrb[72].mxu0  ;;  %3756 = vmatprep.subr.bf16.mxu1 %v4819_v5 }
 0x84f   :  { %v1980_v19 = vadd.f32 %v4800_v47, %v1956_v29  ;;  %v1903_v58 = vadd.f32 %v3750_v38, %v4787_v35  ;;  %v1894_v31 = vpop.f32.mrb[73].mxu0  ;;  %3757 = vmatpush3.bf16.msra.mxu1 %v4819_v5  ;;  %v1995_v6 = vmax.f32 %v1979_v28, 0.0 }
 0x850   :  { %v1978_v1 = vadd.f32 %v4800_v47, %v1954_v30  ;;  %v1895_v33 = vadd.f32 %v4787_v35, %v1894_v31  ;;  %v3751_v52 = vpop.f32.mrb[74].mxu0  ;;  %3758 = vmatprep.subr.bf16.mxu1 %v4816_v25  ;;  %v1993_v39 = vmax.f32 %v1977_v18, 0.0 }
 0x851   :  { %v1996_v62 = vmax.f32 %v1980_v19, 0.0  ;;  %v1935_v34 = vmax.f32 %v1903_v58, 0.0  ;;  %v1906_v36 = vadd.f32 %v3751_v52, %v4787_v35  ;;  %v1897_v37 = vpop.f32.mrb[75].mxu0 }
 0x852   :  { %v1994_v43 = vmax.f32 %v1978_v1, 0.0  ;;  %v1933_v45 = vmax.f32 %v1895_v33, 0.0  ;;  %v1898_v54 = vadd.f32 %v4787_v35, %v1897_v37 }
 0x853   :  { %v1959_v46 = vmul.f32 %v4793_v41, %v1935_v34  ;;  %v1936_v9 = vmax.f32 %v1906_v36, 0.0  ;;  %3759 = vmatpush3.bf16.msra.mxu1 %v4816_v25  ;;  %v4836_v13 = vpack.c.bf16 %v1996_v62, %v1995_v6  ;;  %v4911_v6 = vstv %s2111_s19 }
 0x854   :  { %v1957_v48 = vmul.f32 %v4793_v41, %v1933_v45  ;;  %v1934_v2 = vmax.f32 %v1898_v54, 0.0  ;;  %v4839_v32 = vpack.c.bf16 %v1994_v43, %v1993_v39  ;;  %v2112_v62 = vunpack.c.l.bf16 %v4819_v5 }
 0x855   :  { %v1983_v50 = vadd.f32 %v4800_v47, %v1959_v46  ;;  %v1960_v12 = vmul.f32 %v4793_v41, %v1936_v9  ;;  %v2115_v34 = vunpack.c.h.bf16 %v4816_v25  ;;  %v2113_v36 = vunpack.c.h.bf16 %v4819_v5 }
 0x856   :  { %v1981_v15 = vadd.f32 %v4800_v47, %v1957_v48  ;;  %v1958_v16 = vmul.f32 %v4793_v41, %v1934_v2  ;;  %v3754_v17 = vpop.f32.mrb[76].mxu0  ;;  %3760 = vmatprep.subr.bf16.mxu1 %v4839_v32  ;;  %v2129_v43 = vmul.f32 %v4911_v6, %v2112_v62  ;;  %v2116_v5 = vunpack.c.l.bf16 %v4839_v32 }
 0x857   :  { %v1984_v55 = vadd.f32 %v4800_v47, %v1960_v12  ;;  %v1919_v56 = vadd.f32 %v3754_v17, %v4787_v35  ;;  %v1910_v57 = vpop.f32.mrb[77].mxu0  ;;  %3761 = vmatpush3.bf16.msra.mxu1 %v4839_v32  ;;  %v1999_v61 = vmax.f32 %v1983_v50, 0.0  ;;  %v2132_v46 = vmul.f32 %v4911_v6, %v2115_v34 }
 0x858   :  { %v1982_v59 = vadd.f32 %v4800_v47, %v1958_v16  ;;  %v1911_v51 = vadd.f32 %v4787_v35, %v1910_v57  ;;  %v3755_v60 = vpop.f32.mrb[78].mxu0  ;;  %3762 = vmatprep.subr.bf16.mxu1 %v4836_v13  ;;  %v1997_v4 = vmax.f32 %v1981_v15, 0.0  ;;  %v2130_v2 = vmul.f32 %v4911_v6, %v2113_v36 }
 0x859   :  { %v2000_v44 = vmax.f32 %v1984_v55, 0.0  ;;  %v1939_v49 = vmax.f32 %v1919_v56, 0.0  ;;  %v1922_v10 = vadd.f32 %v3755_v60, %v4787_v35  ;;  %v1913_v63 = vpop.f32.mrb[79].mxu0  ;;  %v2118_v15 = vunpack.c.l.bf16 %v4836_v13 }
 0x85a   :  { %v1998_v7 = vmax.f32 %v1982_v59, 0.0  ;;  %v1937_v40 = vmax.f32 %v1911_v51, 0.0  ;;  %v1914_v42 = vadd.f32 %v4787_v35, %v1913_v63  ;;  %v2119_v17 = vunpack.c.h.bf16 %v4836_v13 }
 0x85b   :  { %v1963_v14 = vmul.f32 %v4793_v41, %v1939_v49  ;;  %v1940_v22 = vmax.f32 %v1922_v10, 0.0  ;;  %3763 = vmatpush3.bf16.msra.mxu1 %v4836_v13  ;;  %v4856_v24 = vpack.c.bf16 %v2000_v44, %v1999_v61  ;;  %v2117_v56 = vunpack.c.h.bf16 %v4839_v32 }
 0x85c   :  { %v1961_v8 = vmul.f32 %v4793_v41, %v1937_v40  ;;  %v1938_v26 = vmax.f32 %v1914_v42, 0.0  ;;  %v4859_v27 = vpack.c.bf16 %v1998_v7, %v1997_v4  ;;  %v2135_v57 = vmul.f32 %v4911_v6, %v2118_v15 }
 0x85d   :  { %v1987_v28 = vadd.f32 %v4800_v47, %v1963_v14  ;;  %v1964_v29 = vmul.f32 %v4793_v41, %v1940_v22  ;;  %v2133_v51 = vmul.f32 %v4911_v6, %v2116_v5  ;;  %v2136_v44 = vmul.f32 %v4911_v6, %v2119_v17 }
 0x85e   :  { %v1985_v18 = vadd.f32 %v4800_v47, %v1961_v8  ;;  %v1962_v35 = vmul.f32 %v4793_v41, %v1938_v26  ;;  %3764 = vmatprep.subr.bf16.mxu1 %v4859_v27  ;;  %v4005_v41 = vld [vmem:[%s5147_s4 + $0xf0] sm:$0xff]   ;;  %v2134_v63 = vmul.f32 %v4911_v6, %v2117_v56  ;;  %v2122_v7 = vunpack.c.l.bf16 %v4856_v24 }
 0x85f   :  { %v1988_v30 = vadd.f32 %v4800_v47, %v1964_v29  ;;  %3765 = vmatpush3.bf16.msra.mxu1 %v4859_v27  ;;  %v2003_v19 = vmax.f32 %v1987_v28, 0.0  ;;  %3800 = vmatprep.subr.bf16.mxu0 %v4005_v41  ;;  %v2120_v40 = vunpack.c.l.bf16 %v4859_v27  ;;  %v2123_v14 = vunpack.c.h.bf16 %v4856_v24 }
 0x860   :  { %v1986_v38 = vadd.f32 %v4800_v47, %v1962_v35  ;;  %3766 = vmatprep.subr.bf16.mxu1 %v4856_v24  ;;  %v2001_v31 = vmax.f32 %v1985_v18, 0.0  ;;  %3801 = vmatpush3.bf16.msra.mxu0 %v4005_v41  ;;  %v2114_v47 = vunpack.c.l.bf16 %v4816_v25  ;;  %v2121_v8 = vunpack.c.h.bf16 %v4859_v27 }
 0x861   :  { %v2004_v58 = vmax.f32 %v1988_v30, 0.0  ;;  %v2139_v26 = vmul.f32 %v4911_v6, %v2122_v7  ;;  %v2137_v29 = vmul.f32 %v4911_v6, %v2120_v40  ;;  %v2140_v30 = vmul.f32 %v4911_v6, %v2123_v14 }
 0x862   :  { %v2002_v1 = vmax.f32 %v1986_v38, 0.0  ;;  %v2131_v37 = vmul.f32 %v4911_v6, %v2114_v47 }
 0x863   :  { %3767 = vmatpush3.bf16.msra.mxu1 %v4856_v24  ;;  %v4871_v33 = vpack.c.bf16 %v2004_v58, %v2003_v19  ;;  %v2138_v58 = vmul.f32 %v4911_v6, %v2121_v8 }
 0x864   :  { %v4873_v52 = vpack.c.bf16 %v2002_v1, %v2001_v31 }
 0x865   :  { %v2126_v1 = vunpack.c.l.bf16 %v4871_v33 }
 0x866   :  { %3768 = vmatprep.subr.bf16.mxu1 %v4873_v52  ;;  %v2124_v41 = vunpack.c.l.bf16 %v4873_v52 }
 0x867   :  { %3769 = vmatpush3.bf16.msra.mxu1 %v4873_v52 }
 0x868   :  { %3770 = vmatprep.subr.bf16.mxu1 %v4871_v33 }
 0x86b   :  { %3771 = vmatpush3.bf16.msra.mxu1 %v4871_v33 }
 0x86e   :  { %3773 = vmatmul.mubr.bf16.vlgmr.msra.gmra.mrb[64].mxu1 %v4659_v11  ;;  %v4006_v11 = vld [vmem:[%s5147_s4 + $0xf8] sm:$0xff]  }
 0x86f   :  { %3776 = vmatprep.mubr.bf16.mxu1 %v4665_v23  ;;  %3802 = vmatprep.subr.bf16.mxu0 %v4006_v11  ;;  %v4007_v23 = vld [vmem:[%s5149_s6 + $0xc0] sm:$0xff]  }
 0x870   :  { %3803 = vmatpush3.bf16.msra.mxu0 %v4006_v11  ;;  %3820 = vmatprep.subr.bf16.mxu1 %v4007_v23 }
 0x871   :  { %3821 = vmatpush3.bf16.msra.mxu1 %v4007_v23  ;;  %v2127_v23 = vunpack.c.h.bf16 %v4871_v33 }
 0x873   :  { %v2144_v34 = vmul.f32 %v4911_v6, %v2127_v23 }
 0x876   :  { %3777 = vmatmul.mubr.bf16.gmra.mrb[68].mxu1 %v4671_v20  ;;  %v4008_v20 = vld [vmem:[%s5149_s6 + $0xc8] sm:$0xff]  }
 0x877   :  { %3780 = vmatprep.mubr.bf16.mxu1 %v4677_v21  ;;  %3822 = vmatprep.subr.bf16.mxu1 %v4008_v20  ;;  %v4009_v21 = vld [vmem:[%s5149_s6 + $0xd0] sm:$0xff]  }
 0x878   :  { %3823 = vmatpush3.bf16.msra.mxu1 %v4008_v20 }
 0x879   :  { %3824 = vmatprep.subr.bf16.mxu1 %v4009_v21 }
 0x87c   :  { %3825 = vmatpush3.bf16.msra.mxu1 %v4009_v21  ;;  %v2125_v21 = vunpack.c.h.bf16 %v4873_v52 }
 0x87e   :  { %3781 = vmatmul.mubr.bf16.gmra.mrb[72].mxu1 %v4683_v0  ;;  %v4010_v0 = vld [vmem:[%s5149_s6 + $0xd8] sm:$0xff]  }
 0x87f   :  { %3784 = vmatprep.mubr.bf16.mxu1 %v4689_v3  ;;  %3826 = vmatprep.subr.bf16.mxu1 %v4010_v0  ;;  %v4011_v3 = vld [vmem:[%s5149_s6 + $0xe0] sm:$0xff]  }
 0x880   :  { %3827 = vmatpush3.bf16.msra.mxu1 %v4010_v0  ;;  %v2143_v0 = vmul.f32 %v4911_v6, %v2126_v1 }
 0x881   :  { %3828 = vmatprep.subr.bf16.mxu1 %v4011_v3 }
 0x884   :  { %3829 = vmatpush3.bf16.msra.mxu1 %v4011_v3 }
 0x886   :  { %3785 = vmatmul.mubr.bf16.gmra.mrb[76].mxu1 %v4695_v53  ;;  %v4012_v53 = vld [vmem:[%s5149_s6 + $0xe8] sm:$0xff]  }
 0x887   :  { %3830 = vmatprep.subr.bf16.mxu1 %v4012_v53 }
 0x888   :  { %3831 = vmatpush3.bf16.msra.mxu1 %v4012_v53  ;;  %v2141_v53 = vmul.f32 %v4911_v6, %v2124_v41 }
 0x941   :  { %v3774_v39 = vpop.f32.mrb[64].mxu1 }
 0x942   :  { %v2147_v45 = vadd.f32 %v3774_v39, %v2131_v37  ;;  %v2048_v54 = vpop.f32.mrb[65].mxu1  ;;  %v2142_v39 = vmul.f32 %v4911_v6, %v2125_v21  ;;  %v3174_v6 = vld [vmem:[%s5148_s5 + $0x3] ss:$0 sm:$0xff] }
 0x943   :  { %v2145_v9 = vadd.f32 %v2129_v43, %v2048_v54  ;;  %v3775_v48 = vpop.f32.mrb[66].mxu1 }
 0x944   :  { %v2148_v50 = vadd.f32 %v3775_v48, %v2132_v46  ;;  %v2051_v12 = vpop.f32.mrb[67].mxu1  ;;  %v4013_v46 = vld [vmem:[%s5149_s6 + $0xf0] sm:$0xff]  }
 0x945   :  { %v2146_v25 = vadd.f32 %v2130_v2, %v2051_v12  ;;  %3832 = vmatprep.subr.bf16.mxu1 %v4013_v46 }
 0x946   :  { %v2162_v16 = vpack.c.bf16 %v2148_v50, %v2147_v45  ;;  %3833 = vmatpush3.bf16.msra.mxu1 %v4013_v46  ;;  %v4019_v46 = vld [vmem:[%s5153_s10 + $0x20] sm:$0xff]  }
 0x947   :  { %v2161_v55 = vpack.c.bf16 %v2146_v25, %v2145_v9  ;;  %v4014_v9 = vld [vmem:[%s5149_s6 + $0xf8] sm:$0xff]  }
 0x948   :  { %3834 = vmatprep.subr.bf16.mxu1 %v4014_v9 }
 0x949   :  { %v3778_v59 = vpop.f32.mrb[68].mxu1  ;;  %3804 = vmatprep.mubr.bf16.mxu0 %v2161_v55 }
 0x94a   :  { %v2151_v60 = vadd.f32 %v3778_v59, %v2135_v57  ;;  %v2064_v61 = vpop.f32.mrb[69].mxu1  ;;  %3805 = vmatmul.mubr.bf16.vlgmr.msra.gmra.mrb[80].mxu0 %v2162_v16  ;;  %3835 = vmatpush3.bf16.msra.mxu1 %v4014_v9  ;;  %v4020_v9 = vld [vmem:[%s5153_s10 + $0x28] sm:$0xff]  }
 0x94b   :  { %v2149_v49 = vadd.f32 %v2133_v51, %v2064_v61  ;;  %v3779_v10 = vpop.f32.mrb[70].mxu1 }
 0x94c   :  { %v2152_v4 = vadd.f32 %v3779_v10, %v2136_v44  ;;  %v2067_v13 = vpop.f32.mrb[71].mxu1 }
 0x94d   :  { %v2150_v32 = vadd.f32 %v2134_v63, %v2067_v13 }
 0x94e   :  { %v2164_v42 = vpack.c.bf16 %v2152_v4, %v2151_v60 }
 0x94f   :  { %v2163_v22 = vpack.c.bf16 %v2150_v32, %v2149_v49 }
 0x951   :  { %v3782_v28 = vpop.f32.mrb[72].mxu1  ;;  %3808 = vmatprep.mubr.bf16.mxu0 %v2163_v22 }
 0x952   :  { %v2155_v18 = vadd.f32 %v3782_v28, %v2139_v26  ;;  %v2080_v35 = vpop.f32.mrb[73].mxu1  ;;  %3809 = vmatmul.mubr.bf16.gmra.mrb[84].mxu0 %v2164_v42 }
 0x953   :  { %v2153_v38 = vadd.f32 %v2137_v29, %v2080_v35  ;;  %v3783_v19 = vpop.f32.mrb[74].mxu1 }
 0x954   :  { %v2156_v31 = vadd.f32 %v3783_v19, %v2140_v30  ;;  %v2083_v24 = vpop.f32.mrb[75].mxu1 }
 0x955   :  { %v2154_v27 = vadd.f32 %v2138_v58, %v2083_v24 }
 0x956   :  { %v2166_v11 = vpack.c.bf16 %v2156_v31, %v2155_v18 }
 0x957   :  { %v2165_v20 = vpack.c.bf16 %v2154_v27, %v2153_v38 }
 0x959   :  { %v3786_v3 = vpop.f32.mrb[76].mxu1  ;;  %3812 = vmatprep.mubr.bf16.mxu0 %v2165_v20 }
 0x95a   :  { %v2159_v47 = vadd.f32 %v3786_v3, %v2143_v0  ;;  %v2096_v62 = vpop.f32.mrb[77].mxu1  ;;  %3813 = vmatmul.mubr.bf16.gmra.mrb[88].mxu0 %v2166_v11 }
 0x95b   :  { %v2157_v36 = vadd.f32 %v2141_v53, %v2096_v62  ;;  %v3787_v37 = vpop.f32.mrb[78].mxu1 }
 0x95c   :  { %v2160_v43 = vadd.f32 %v3787_v37, %v2144_v34  ;;  %v2099_v33 = vpop.f32.mrb[79].mxu1 }
 0x95d   :  { %v2158_v45 = vadd.f32 %v2142_v39, %v2099_v33  ;;  %v4015_v33 = vld [vmem:[%s5153_s10] sm:$0xff]  }
 0x95e   :  { %v2168_v54 = vpack.c.bf16 %v2160_v43, %v2159_v47  ;;  %v4070_v43 = vmov 0.0  }
 0x95f   :  { %v2167_v52 = vpack.c.bf16 %v2158_v45, %v2157_v36  ;;  %3852 = vmatprep.subr.bf16.mxu0 %v4070_v43  ;;  %3872 = vmatprep.subr.bf16.mxu1 %v4070_v43  ;;  %v4016_v45 = vld [vmem:[%s5153_s10 + $0x8] sm:$0xff]  }
 0x961   :  { %3816 = vmatprep.mubr.bf16.mxu0 %v2167_v52  ;;  %v4018_v52 = vld [vmem:[%s5153_s10 + $0x18] sm:$0xff]  }
 0x962   :  { %3817 = vmatmul.mubr.bf16.gmra.mrb[92].mxu0 %v2168_v54  ;;  %v4017_v54 = vld [vmem:[%s5153_s10 + $0x10] sm:$0xff]  }
 0x963   :  { %3868 = vmatprep.mubr.msk.bf16.mxu0 %vm4071_vm0, %v4070_v43 }
 0xa1d   :  { %v3806_v48 = vpop.f32.mrb[80].mxu0 }
 0xa1e   :  { %v2285_v2 = vadd.f32 %v3806_v48, %v3174_v6  ;;  %v2276_v50 = vpop.f32.mrb[81].mxu0  ;;  %v4990_v48 = vld [vmem:[%s5150_s7 + $0x3] ss:$0 sm:$0xff] }
 0xa1f   :  { %v2277_v12 = vadd.f32 %v3174_v6, %v2276_v50  ;;  %v3807_v15 = vpop.f32.mrb[82].mxu0 }
 0xa20   :  { %v2288_v25 = vadd.f32 %v3807_v15, %v3174_v6  ;;  %v2279_v5 = vpop.f32.mrb[83].mxu0  ;;  %v2341_v17 = vmax.f32 %v2285_v2, 0.0  ;;  %v4996_v15 = vld [vmem:[%s5151_s8 + $0x3] ss:$0 sm:$0xff] }
 0xa21   :  { %v2280_v16 = vadd.f32 %v3174_v6, %v2279_v5  ;;  %v2339_v56 = vmax.f32 %v2277_v12, 0.0 }
 0xa22   :  { %v2342_v55 = vmax.f32 %v2288_v25, 0.0 }
 0xa23   :  { %v2340_v57 = vmax.f32 %v2280_v16, 0.0 }
 0xa24   :  { %v2356_v59 = vpack.c.bf16 %v2342_v55, %v2341_v17 }
 0xa25   :  { %v2355_v51 = vpack.c.bf16 %v2340_v57, %v2339_v56  ;;  %v3810_v60 = vpop.f32.mrb[84].mxu0  ;;  %v5003_v56 = vld [vmem:[%s5152_s9 + $0x3] ss:$0 sm:$0xff] }
 0xa26   :  { %v2301_v61 = vadd.f32 %v3810_v60, %v3174_v6  ;;  %v2292_v44 = vpop.f32.mrb[85].mxu0 }
 0xa27   :  { %v2293_v49 = vadd.f32 %v3174_v6, %v2292_v44  ;;  %v3811_v10 = vpop.f32.mrb[86].mxu0  ;;  %3836 = vmatprep.mubr.bf16.mxu1 %v2355_v51 }
 0xa28   :  { %v2304_v63 = vadd.f32 %v3811_v10, %v3174_v6  ;;  %v2295_v4 = vpop.f32.mrb[87].mxu0  ;;  %3837 = vmatmul.mubr.bf16.vlgmr.msra.gmra.mrb[80].mxu1 %v2356_v59  ;;  %v2345_v7 = vmax.f32 %v2301_v61, 0.0 }
 0xa29   :  { %v2296_v13 = vadd.f32 %v3174_v6, %v2295_v4  ;;  %v2343_v40 = vmax.f32 %v2293_v49, 0.0  ;;  %3873 = vmatpush3.bf16.msra.mxu1 %v4015_v33 }
 0xa2a   :  { %v2346_v32 = vmax.f32 %v2304_v63, 0.0  ;;  %3874 = vmatprep.subr.bf16.mxu1 %v4070_v43 }
 0xa2b   :  { %v2344_v42 = vmax.f32 %v2296_v13, 0.0 }
 0xa2c   :  { %v2358_v14 = vpack.c.bf16 %v2346_v32, %v2345_v7 }
 0xa2d   :  { %v2357_v22 = vpack.c.bf16 %v2344_v42, %v2343_v40  ;;  %v3814_v8 = vpop.f32.mrb[88].mxu0  ;;  %3875 = vmatpush3.bf16.msra.mxu1 %v4016_v45 }
 0xa2e   :  { %v2317_v26 = vadd.f32 %v3814_v8, %v3174_v6  ;;  %v2308_v28 = vpop.f32.mrb[89].mxu0  ;;  %3876 = vmatprep.subr.bf16.mxu1 %v4070_v43 }
 0xa2f   :  { %v2309_v29 = vadd.f32 %v3174_v6, %v2308_v28  ;;  %v3815_v18 = vpop.f32.mrb[90].mxu0  ;;  %3840 = vmatprep.mubr.bf16.mxu1 %v2357_v22 }
 0xa30   :  { %v2320_v35 = vadd.f32 %v3815_v18, %v3174_v6  ;;  %v2311_v30 = vpop.f32.mrb[91].mxu0  ;;  %3841 = vmatmul.mubr.bf16.gmra.mrb[84].mxu1 %v2358_v14  ;;  %v2349_v19 = vmax.f32 %v2317_v26, 0.0 }
 0xa31   :  { %v2312_v38 = vadd.f32 %v3174_v6, %v2311_v30  ;;  %v2347_v31 = vmax.f32 %v2309_v29, 0.0  ;;  %3877 = vmatpush3.bf16.msra.mxu1 %v4017_v54 }
 0xa32   :  { %v2350_v58 = vmax.f32 %v2320_v35, 0.0  ;;  %3878 = vmatprep.subr.bf16.mxu1 %v4070_v43 }
 0xa33   :  { %v2348_v24 = vmax.f32 %v2312_v38, 0.0 }
 0xa34   :  { %v2360_v1 = vpack.c.bf16 %v2350_v58, %v2349_v19 }
 0xa35   :  { %v2359_v27 = vpack.c.bf16 %v2348_v24, %v2347_v31  ;;  %v3818_v41 = vpop.f32.mrb[92].mxu0  ;;  %3879 = vmatpush3.bf16.msra.mxu1 %v4018_v52 }
 0xa36   :  { %v2333_v11 = vadd.f32 %v3818_v41, %v3174_v6  ;;  %v2324_v23 = vpop.f32.mrb[93].mxu0  ;;  %3880 = vmatprep.subr.bf16.mxu1 %v4070_v43 }
 0xa37   :  { %v2325_v20 = vadd.f32 %v3174_v6, %v2324_v23  ;;  %v3819_v21 = vpop.f32.mrb[94].mxu0  ;;  %3844 = vmatprep.mubr.bf16.mxu1 %v2359_v27 }
 0xa38   :  { %v2336_v0 = vadd.f32 %v3819_v21, %v3174_v6  ;;  %v2327_v3 = vpop.f32.mrb[95].mxu0  ;;  %3845 = vmatmul.mubr.bf16.gmra.mrb[88].mxu1 %v2360_v1  ;;  %v2353_v47 = vmax.f32 %v2333_v11, 0.0 }
 0xa39   :  { %v2328_v53 = vadd.f32 %v3174_v6, %v2327_v3  ;;  %v2351_v34 = vmax.f32 %v2325_v20, 0.0  ;;  %3881 = vmatpush3.bf16.msra.mxu1 %v4019_v46  ;;  %v4021_v6 = vld [vmem:[%s5153_s10 + $0x30] sm:$0xff]  }
 0xa3a   :  { %v2354_v62 = vmax.f32 %v2336_v0, 0.0  ;;  %3882 = vmatprep.subr.bf16.mxu1 %v4070_v43 }
 0xa3b   :  { %v2352_v36 = vmax.f32 %v2328_v53, 0.0 }
 0xa3c   :  { %v2362_v37 = vpack.c.bf16 %v2354_v62, %v2353_v47 }
 0xa3d   :  { %v2361_v39 = vpack.c.bf16 %v2352_v36, %v2351_v34  ;;  %3883 = vmatpush3.bf16.msra.mxu1 %v4020_v9 }
 0xa3e   :  { %3884 = vmatprep.subr.bf16.mxu1 %v4070_v43 }
 0xa3f   :  { %3848 = vmatprep.mubr.bf16.mxu1 %v2361_v39 }
 0xa40   :  { %3849 = vmatmul.mubr.bf16.gmra.mrb[92].mxu1 %v2362_v37 }
 0xa41   :  { %3888 = vmatprep.mubr.msk.bf16.mxu1 %vm4071_vm0, %v4070_v43  ;;  %3885 = vmatpush3.bf16.msra.mxu1 %v4021_v6 }
 0xa42   :  { %3886 = vmatprep.subr.bf16.mxu1 %v4070_v43 }
 0xafb   :  { %v3838_v2 = vpop.f32.mrb[80].mxu1 }
 0xafc   :  { %v2479_v50 = vadd.f32 %v3838_v2, %v4990_v48  ;;  %v2470_v12 = vpop.f32.mrb[81].mxu1 }
 0xafd   :  { %v2471_v25 = vadd.f32 %v4990_v48, %v2470_v12  ;;  %v3839_v5 = vpop.f32.mrb[82].mxu1 }
 0xafe   :  { %v2535_v16 = vmax.f32 %v2479_v50, 0.0  ;;  %v2482_v17 = vadd.f32 %v3839_v5, %v4990_v48  ;;  %v2473_v55 = vpop.f32.mrb[83].mxu1 }
 0xaff   :  { %v2533_v57 = vmax.f32 %v2471_v25, 0.0  ;;  %v2474_v59 = vadd.f32 %v4990_v48, %v2473_v55 }
 0xb00   :  { %v2559_v51 = vmul.f32 %v4996_v15, %v2535_v16  ;;  %v2536_v60 = vmax.f32 %v2482_v17, 0.0 }
 0xb01   :  { %v2557_v61 = vmul.f32 %v4996_v15, %v2533_v57  ;;  %v2534_v44 = vmax.f32 %v2474_v59, 0.0 }
 0xb02   :  { %v2583_v49 = vadd.f32 %v5003_v56, %v2559_v51  ;;  %v2560_v10 = vmul.f32 %v4996_v15, %v2536_v60 }
 0xb03   :  { %v2581_v63 = vadd.f32 %v5003_v56, %v2557_v61  ;;  %v2558_v4 = vmul.f32 %v4996_v15, %v2534_v44  ;;  %v3842_v13 = vpop.f32.mrb[84].mxu1 }
 0xb04   :  { %v2584_v7 = vadd.f32 %v5003_v56, %v2560_v10  ;;  %v2495_v32 = vadd.f32 %v3842_v13, %v4990_v48  ;;  %v2486_v40 = vpop.f32.mrb[85].mxu1  ;;  %v2599_v8 = vmax.f32 %v2583_v49, 0.0 }
 0xb05   :  { %v2582_v42 = vadd.f32 %v5003_v56, %v2558_v4  ;;  %v2487_v14 = vadd.f32 %v4990_v48, %v2486_v40  ;;  %v3843_v22 = vpop.f32.mrb[86].mxu1  ;;  %v2597_v35 = vmax.f32 %v2581_v63, 0.0 }
 0xb06   :  { %v2600_v26 = vmax.f32 %v2584_v7, 0.0  ;;  %v2539_v28 = vmax.f32 %v2495_v32, 0.0  ;;  %v2498_v29 = vadd.f32 %v3843_v22, %v4990_v48  ;;  %v2489_v18 = vpop.f32.mrb[87].mxu1 }
 0xb07   :  { %v2598_v30 = vmax.f32 %v2582_v42, 0.0  ;;  %v2537_v38 = vmax.f32 %v2487_v14, 0.0  ;;  %v2490_v19 = vadd.f32 %v4990_v48, %v2489_v18 }
 0xb08   :  { %v2563_v58 = vmul.f32 %v4996_v15, %v2539_v28  ;;  %v2540_v31 = vmax.f32 %v2498_v29, 0.0  ;;  %v2614_v24 = vpack.c.bf16 %v2600_v26, %v2599_v8 }
 0xb09   :  { %v2561_v1 = vmul.f32 %v4996_v15, %v2537_v38  ;;  %v2538_v27 = vmax.f32 %v2490_v19, 0.0  ;;  %v2613_v41 = vpack.c.bf16 %v2598_v30, %v2597_v35 }
 0xb0a   :  { %v2587_v11 = vadd.f32 %v5003_v56, %v2563_v58  ;;  %v2564_v23 = vmul.f32 %v4996_v15, %v2540_v31 }
 0xb0b   :  { %v2585_v20 = vadd.f32 %v5003_v56, %v2561_v1  ;;  %v2562_v21 = vmul.f32 %v4996_v15, %v2538_v27  ;;  %v3846_v0 = vpop.f32.mrb[88].mxu1  ;;  %3853 = vmatpush3.bf16.msra.mxu0 %v2613_v41 }
 0xb0c   :  { %v2588_v3 = vadd.f32 %v5003_v56, %v2564_v23  ;;  %v2511_v53 = vadd.f32 %v3846_v0, %v4990_v48  ;;  %v2502_v47 = vpop.f32.mrb[89].mxu1  ;;  %3854 = vmatprep.subr.bf16.mxu0 %v4070_v43  ;;  %v2603_v37 = vmax.f32 %v2587_v11, 0.0  ;;  %v4024_v0 = vld [vmem:[%s5155_s12 + $0x8] sm:$0xff]  }
 0xb0d   :  { %v2586_v62 = vadd.f32 %v5003_v56, %v2562_v21  ;;  %v2503_v34 = vadd.f32 %v4990_v48, %v2502_v47  ;;  %v3847_v36 = vpop.f32.mrb[90].mxu1  ;;  %v2601_v52 = vmax.f32 %v2585_v20, 0.0  ;;  %v4023_v21 = vld [vmem:[%s5155_s12] sm:$0xff]  }
 0xb0e   :  { %v2604_v39 = vmax.f32 %v2588_v3, 0.0  ;;  %v2543_v33 = vmax.f32 %v2511_v53, 0.0  ;;  %v2514_v45 = vadd.f32 %v3847_v36, %v4990_v48  ;;  %v2505_v54 = vpop.f32.mrb[91].mxu1  ;;  %v4025_v3 = vld [vmem:[%s5155_s12 + $0x10] sm:$0xff]   ;;  %v4026_v53 = vld [vmem:[%s5155_s12 + $0x18] sm:$0xff]   ;;  %v4027_v47 = vld [vmem:[%s5155_s12 + $0x20] sm:$0xff]  }
 0xb0f   :  { %v2602_v46 = vmax.f32 %v2586_v62, 0.0  ;;  %v2541_v9 = vmax.f32 %v2503_v34, 0.0  ;;  %v2506_v6 = vadd.f32 %v4990_v48, %v2505_v54  ;;  %3855 = vmatpush3.bf16.msra.mxu0 %v2614_v24  ;;  %v4028_v62 = vld [vmem:[%s5155_s12 + $0x28] sm:$0xff]   ;;  %v4030_v54 = vld [vmem:[%s5155_s12 + $0x38] sm:$0xff]  }
 0xb10   :  { %v2567_v2 = vmul.f32 %v4996_v15, %v2543_v33  ;;  %v2544_v50 = vmax.f32 %v2514_v45, 0.0  ;;  %3856 = vmatprep.subr.bf16.mxu0 %v4070_v43  ;;  %v2616_v12 = vpack.c.bf16 %v2604_v39, %v2603_v37  ;;  %v4029_v45 = vld [vmem:[%s5155_s12 + $0x30] sm:$0xff]  }
 0xb11   :  { %v2565_v25 = vmul.f32 %v4996_v15, %v2541_v9  ;;  %v2542_v5 = vmax.f32 %v2506_v6, 0.0  ;;  %v2615_v16 = vpack.c.bf16 %v2602_v46, %v2601_v52  ;;  %v4031_v52 = vld [vmem:[%s5157_s14] sm:$0xff]   ;;  %v4032_v46 = vld [vmem:[%s5157_s14 + $0x8] sm:$0xff]   ;;  %v4033_v9 = vld [vmem:[%s5157_s14 + $0x10] sm:$0xff]  }
 0xb12   :  { %v2591_v17 = vadd.f32 %v5003_v56, %v2567_v2  ;;  %v2568_v55 = vmul.f32 %v4996_v15, %v2544_v50  ;;  %v4034_v6 = vld [vmem:[%s5157_s14 + $0x18] sm:$0xff]   ;;  %v4035_v2 = vld [vmem:[%s5157_s14 + $0x20] sm:$0xff]   ;;  %v4036_v50 = vld [vmem:[%s5157_s14 + $0x28] sm:$0xff]  }
 0xb13   :  { %v2589_v57 = vadd.f32 %v5003_v56, %v2565_v25  ;;  %v2566_v59 = vmul.f32 %v4996_v15, %v2542_v5  ;;  %v3850_v51 = vpop.f32.mrb[92].mxu1  ;;  %3857 = vmatpush3.bf16.msra.mxu0 %v2615_v16 }
 0xb14   :  { %v2592_v60 = vadd.f32 %v5003_v56, %v2568_v55  ;;  %v2527_v61 = vadd.f32 %v3850_v51, %v4990_v48  ;;  %v2518_v44 = vpop.f32.mrb[93].mxu1  ;;  %3858 = vmatprep.subr.bf16.mxu0 %v4070_v43  ;;  %v2607_v4 = vmax.f32 %v2591_v17, 0.0  ;;  %v4037_v51 = vld [vmem:[%s5157_s14 + $0x30] sm:$0xff]  }
 0xb15   :  { %v2590_v49 = vadd.f32 %v5003_v56, %v2566_v59  ;;  %v2519_v10 = vadd.f32 %v4990_v48, %v2518_v44  ;;  %v3851_v63 = vpop.f32.mrb[94].mxu1  ;;  %v2605_v42 = vmax.f32 %v2589_v57, 0.0 }
 0xb16   :  { %v2608_v13 = vmax.f32 %v2592_v60, 0.0  ;;  %v2547_v7 = vmax.f32 %v2527_v61, 0.0  ;;  %v2530_v32 = vadd.f32 %v3851_v63, %v4990_v48  ;;  %v2521_v40 = vpop.f32.mrb[95].mxu1  ;;  %v4038_v60 = vld [vmem:[%s5157_s14 + $0x38] sm:$0xff]   ;;  %v3222_v61 = vld [vmem:[%s5156_s13] ss:$0 sm:$0xff] }
 0xb17   :  { %v2606_v14 = vmax.f32 %v2590_v49, 0.0  ;;  %v2545_v22 = vmax.f32 %v2519_v10, 0.0  ;;  %v2522_v8 = vadd.f32 %v4990_v48, %v2521_v40  ;;  %3859 = vmatpush3.bf16.msra.mxu0 %v2616_v12  ;;  %v3213_v12 = vld [vmem:[%s5154_s11] ss:$0 sm:$0xff] }
 0xb18   :  { %v2571_v26 = vmul.f32 %v4996_v15, %v2547_v7  ;;  %v2548_v28 = vmax.f32 %v2530_v32, 0.0  ;;  %3860 = vmatprep.subr.bf16.mxu0 %v4070_v43  ;;  %v2618_v29 = vpack.c.bf16 %v2608_v13, %v2607_v4 }
 0xb19   :  { %v2569_v18 = vmul.f32 %v4996_v15, %v2545_v22  ;;  %v2546_v35 = vmax.f32 %v2522_v8, 0.0  ;;  %v2617_v30 = vpack.c.bf16 %v2606_v14, %v2605_v42 }
 0xb1a   :  { %v2595_v38 = vadd.f32 %v5003_v56, %v2571_v26  ;;  %v2572_v19 = vmul.f32 %v4996_v15, %v2548_v28 }
 0xb1b   :  { %v2593_v58 = vadd.f32 %v5003_v56, %v2569_v18  ;;  %v2570_v31 = vmul.f32 %v4996_v15, %v2546_v35  ;;  %3861 = vmatpush3.bf16.msra.mxu0 %v2617_v30  ;;  %v2621_v15 = vld [vmem:[%s5146_s3] sm:$0xf] }
 0xb1c   :  { %v2596_v48 = vadd.f32 %v5003_v56, %v2572_v19  ;;  %3862 = vmatprep.subr.bf16.mxu0 %v4070_v43  ;;  %v2611_v1 = vmax.f32 %v2595_v38, 0.0 }
 0xb1d   :  { %v2594_v24 = vadd.f32 %v5003_v56, %v2570_v31  ;;  %v2609_v41 = vmax.f32 %v2593_v58, 0.0  ;;  %v4022_v56 = vld [vmem:[%s5153_s10 + $0x38] sm:$0xff]  }
 0xb1e   :  { %v2612_v27 = vmax.f32 %v2596_v48, 0.0  ;;  %3887 = vmatpush3.bf16.msra.mxu1 %v4022_v56 }
 0xb1f   :  { %v2610_v11 = vmax.f32 %v2594_v24, 0.0  ;;  %3863 = vmatpush3.bf16.msra.mxu0 %v2618_v29  ;;  %3912 = vmatprep.subr.bf16.mxu1 %v4070_v43 }
 0xb20   :  { %3864 = vmatprep.subr.bf16.mxu0 %v4070_v43  ;;  %v2620_v23 = vpack.c.bf16 %v2612_v27, %v2611_v1 }
 0xb21   :  { %v2619_v20 = vpack.c.bf16 %v2610_v11, %v2609_v41 }
 0xb23   :  { %3865 = vmatpush3.bf16.msra.mxu0 %v2619_v20 }
 0xb24   :  { %3866 = vmatprep.subr.bf16.mxu0 %v4070_v43 }
 0xb27   :  { %3867 = vmatpush3.bf16.msra.mxu0 %v2620_v23 }
 0xb28   :  { %3892 = vmatprep.subr.bf16.mxu0 %v4070_v43 }
 0xb2a   :  { %3869 = vmatmul.mubr.bf16.vlgmr.msra.gmra.mrb[96].mxu0 %v2621_v15 }
 0xb2b   :  { %3908 = vmatprep.mubr.msk.bf16.mxu0 %vm4071_vm0, %v4070_v43  ;;  %3893 = vmatpush3.bf16.msra.mxu0 %v4023_v21 }
 0xb2c   :  { %3894 = vmatprep.subr.bf16.mxu0 %v4070_v43 }
 0xb2f   :  { %3895 = vmatpush3.bf16.msra.mxu0 %v4024_v0 }
 0xb30   :  { %3896 = vmatprep.subr.bf16.mxu0 %v4070_v43 }
 0xb33   :  { %3897 = vmatpush3.bf16.msra.mxu0 %v4025_v3 }
 0xb34   :  { %3898 = vmatprep.subr.bf16.mxu0 %v4070_v43 }
 0xb37   :  { %3899 = vmatpush3.bf16.msra.mxu0 %v4026_v53 }
 0xb38   :  { %3900 = vmatprep.subr.bf16.mxu0 %v4070_v43 }
 0xb3b   :  { %3901 = vmatpush3.bf16.msra.mxu0 %v4027_v47 }
 0xb3c   :  { %3902 = vmatprep.subr.bf16.mxu0 %v4070_v43 }
 0xb3f   :  { %3903 = vmatpush3.bf16.msra.mxu0 %v4028_v62 }
 0xb40   :  { %3904 = vmatprep.subr.bf16.mxu0 %v4070_v43 }
 0xb43   :  { %3905 = vmatpush3.bf16.msra.mxu0 %v4029_v45 }
 0xb44   :  { %3906 = vmatprep.subr.bf16.mxu0 %v4070_v43 }
 0xb47   :  { %3907 = vmatpush3.bf16.msra.mxu0 %v4030_v54 }
 0xbfd   :  { %v2656_v34 = vpop.f32.mrb[96].mxu0 }
 0xbfe   :  { %v2662_v36 = vpack.c.bf16 %v2656_v34, %v2656_v34  ;;  %v3870_v37 = vpop.f32.mrb[97].mxu0 }
 0xbff   :  { %v2659_v39 = vpop.f32.mrb[98].mxu0 }
 0xc00   :  { %v3871_v33 = vpop.f32.mrb[99].mxu0  ;;  %3889 = vmatmul.mubr.bf16.vlgmr.msra.gmra.mrb[96].mxu1 %v2662_v36 }
 0xc01   :  { %3928 = vmatprep.mubr.msk.bf16.mxu1 %vm4071_vm0, %v4070_v43  ;;  %3913 = vmatpush3.bf16.msra.mxu1 %v4031_v52 }
 0xc02   :  { %3914 = vmatprep.subr.bf16.mxu1 %v4070_v43 }
 0xc05   :  { %3915 = vmatpush3.bf16.msra.mxu1 %v4032_v46 }
 0xc06   :  { %3916 = vmatprep.subr.bf16.mxu1 %v4070_v43 }
 0xc09   :  { %3917 = vmatpush3.bf16.msra.mxu1 %v4033_v9 }
 0xc0a   :  { %3918 = vmatprep.subr.bf16.mxu1 %v4070_v43 }
 0xc0d   :  { %3919 = vmatpush3.bf16.msra.mxu1 %v4034_v6 }
 0xc0e   :  { %3920 = vmatprep.subr.bf16.mxu1 %v4070_v43 }
 0xc11   :  { %3921 = vmatpush3.bf16.msra.mxu1 %v4035_v2 }
 0xc12   :  { %3922 = vmatprep.subr.bf16.mxu1 %v4070_v43 }
 0xc15   :  { %3923 = vmatpush3.bf16.msra.mxu1 %v4036_v50 }
 0xc16   :  { %3924 = vmatprep.subr.bf16.mxu1 %v4070_v43 }
 0xc19   :  { %3925 = vmatpush3.bf16.msra.mxu1 %v4037_v51 }
 0xc1a   :  { %3926 = vmatprep.subr.bf16.mxu1 %v4070_v43  ;;  %v3231_v43 = vld [vmem:[%s5158_s15] ss:$0 sm:$0xff] }
 0xc1d   :  { %3927 = vmatpush3.bf16.msra.mxu1 %v4038_v60 }
 0xcd3   :  { %v2768_v25 = vpop.f32.mrb[96].mxu1 }
 0xcd4   :  { %v2769_v5 = vadd.f32 %v3213_v12, %v2768_v25  ;;  %v3890_v16 = vpop.f32.mrb[97].mxu1 }
 0xcd5   :  { %v2771_v17 = vpop.f32.mrb[98].mxu1 }
 0xcd6   :  { %v2774_v55 = vmax.f32 %v2769_v5, 0.0  ;;  %v3891_v57 = vpop.f32.mrb[99].mxu1 }
 0xcd8   :  { %v2775_v59 = vpack.c.bf16 %v2774_v55, %v2774_v55 }
 0xcda   :  { %3909 = vmatmul.mubr.bf16.vlgmr.msra.gmra.mrb[100].mxu0 %v2775_v59 }
 0xdad   :  { %v2881_v44 = vpop.f32.mrb[100].mxu0 }
 0xdae   :  { %v2882_v49 = vadd.f32 %v3222_v61, %v2881_v44  ;;  %v3910_v10 = vpop.f32.mrb[101].mxu0 }
 0xdaf   :  { %v2884_v63 = vpop.f32.mrb[102].mxu0 }
 0xdb0   :  { %v2887_v4 = vmax.f32 %v2882_v49, 0.0  ;;  %v3911_v13 = vpop.f32.mrb[103].mxu0 }
 0xdb2   :  { %v2888_v7 = vpack.c.bf16 %v2887_v4, %v2887_v4 }
 0xdb4   :  { %3929 = vmatmul.mubr.bf16.vlgmr.msra.gmra.mrb[100].mxu1 %v2888_v7 }
 0xe87   :  { %v2994_v32 = vpop.f32.mrb[100].mxu1 }
 0xe88   :  { %v2995_v40 = vadd.f32 %v3231_v43, %v2994_v32  ;;  %v3930_v42 = vpop.f32.mrb[101].mxu1 }
 0xe89   :  { %v2997_v14 = vpop.f32.mrb[102].mxu1 }
 0xe8a   :  { %3000 = vst [vmem:[%s5159_s16] sm:$0xff] %v2995_v40  ;;  %v3931_v22 = vpop.f32.mrb[103].mxu1 }
 0xe8b   :  { %3005 = vsyncpa [#allocation3], 1 }

</bundles_post_ra>
